<compile_context>
chip_gen: v7x
topology: tpu7x:2x2x1
jax: 0.10.0
libtpu: 0.0.40
codegen_flags: <defaults>
</compile_context>

<pallas_src>
import functools

import jax
import jax.numpy as jnp
import numpy as np
from jax.experimental import pallas as pl
from jax.experimental.pallas import tpu as pltpu


# ------------------------------- Pallas kernel ------------------------------ #

def _conv_gn_silu_kernel(x_ref, w_ref, b_ref, g_ref, bt_ref, gmat_ref, o_ref,
                         *, T, H, Hp, kt, kh, inv_n, eps):
    """Fused Conv3d (implicit GEMM) + GroupNorm + SiLU for one batch element.

    Everything inside the kernel is 2-D (row = flattened (t, h) position with
    stride Hp, lane = w*C + c), so the only data movement besides the matmuls is
    one contiguous row slice per tap.

    x_ref    : (1, Np, WpC)       zero-padded input slab, Np = Tp*Hp rows
    w_ref    : (kt, kh, WpC, WC)  banded (block-Toeplitz over kw) weight, bf16,
                                  VMEM-resident (constant block index)
    b_ref    : (1, WC)            conv bias, lane-tiled  (lane = w*C + c)
    g_ref    : (1, WC)            GroupNorm gamma, lane-tiled
    bt_ref   : (1, WC)            GroupNorm beta,  lane-tiled
    gmat_ref : (WC, WC)           group-broadcast matrix (1 where lanes share a group)
    o_ref    : (1, L, WC)         fused output; row j = t*Hp + h (rows with
                                  h >= H are don't-care and are stripped outside)
    """
    L, WC = o_ref.shape[1], o_ref.shape[2]
    x = x_ref[0].astype(jnp.float32)                     # (Np, WpC); f32 slices

    # --- implicit-GEMM conv: one (L, WpC) @ (WpC, WC) bf16 MXU matmul per tap ---
    acc = jnp.zeros((L, WC), jnp.float32)
    for dt in range(kt):                                  # static taps
        for dh in range(kh):
            start = dt * Hp + dh                          # static row offset
            lhs = x[start:start + L, :].astype(jnp.bfloat16)
            acc = acc + jnp.dot(lhs, w_ref[dt, dh],
                                preferred_element_type=jnp.float32)
    acc = acc + b_ref[...]                                # bias (broadcast)

    # --- GroupNorm (centered two-pass, f32) + SiLU, fused ----------------------
    # Rows with (j % Hp) >= H are geometric garbage; mask them out of the stats.
    row = jax.lax.broadcasted_iota(jnp.int32, (L, 1), 0)
    valid = ((row % Hp) < H).astype(jnp.float32)          # (L, 1)

    s = jnp.sum(acc * valid, axis=0, keepdims=True)                       # (1, WC)
    mean = jnp.dot(s, gmat_ref[...],
                   preferred_element_type=jnp.float32) * inv_n            # per group
    d = (acc - mean) * valid
    q = jnp.sum(d * d, axis=0, keepdims=True)
    var = jnp.dot(q, gmat_ref[...],
                  preferred_element_type=jnp.float32) * inv_n
    scale = g_ref[...] * jax.lax.rsqrt(var + eps)
    shift = bt_ref[...] - mean * scale

    y = acc * scale + shift
    o_ref[0] = (y * jax.nn.sigmoid(y)).astype(o_ref.dtype)


# ------------------------------ pallas wrapper ------------------------------- #

def _fused_conv_gn_silu(x_pad, w_band, bias_l, gamma_l, beta_l, gmat, *,
                        T, H, Hp, groups, eps, out_dtype):
    """x_pad: (B, Tp*Hp, Wp*Cin) -> fused conv+GN+SiLU output (B, L, W*Cout)."""
    B, Np, WpC = x_pad.shape
    kt, kh = int(w_band.shape[0]), int(w_band.shape[1])
    WC = int(w_band.shape[3])
    L = (T - 1) * Hp + H
    inv_n = 1.0 / float(T * H * (WC // groups))           # elems per (batch, group)

    kern = functools.partial(_conv_gn_silu_kernel, T=T, H=H, Hp=Hp,
                             kt=kt, kh=kh, inv_n=inv_n, eps=eps)

    flops = 2 * B * kt * kh * L * WpC * WC + 4 * B * WC * WC + 10 * B * L * WC
    trans = B * L * WC
    bytes_acc = (B * Np * WpC * x_pad.dtype.itemsize       # activations, read once
                 + kt * kh * WpC * WC * 2                  # bf16 weight, fetched once
                 + WC * WC * 4 + 3 * WC * 4                # group matrix + vectors
                 + B * L * WC * jnp.dtype(out_dtype).itemsize)

    return pl.pallas_call(
        kern,
        out_shape=jax.ShapeDtypeStruct((B, L, WC), out_dtype),
        grid_spec=pltpu.PrefetchScalarGridSpec(
            num_scalar_prefetch=0,
            grid=(B,),                                     # >=2 parallel blocks (v7x)
            in_specs=[
                pl.BlockSpec((1, Np, WpC), lambda b: (b, 0, 0)),
                pl.BlockSpec((kt, kh, WpC, WC), lambda b: (0, 0, 0, 0)),  # resident
                pl.BlockSpec((1, WC), lambda b: (0, 0)),
                pl.BlockSpec((1, WC), lambda b: (0, 0)),
                pl.BlockSpec((1, WC), lambda b: (0, 0)),
                pl.BlockSpec((WC, WC), lambda b: (0, 0)),
            ],
            out_specs=pl.BlockSpec((1, L, WC), lambda b: (b, 0, 0)),
        ),
        compiler_params=pltpu.CompilerParams(
            dimension_semantics=("parallel",)),
        cost_estimate=pl.CostEstimate(flops=int(flops), transcendentals=int(trans),
                                      bytes_accessed=int(bytes_acc)),
    )(x_pad, w_band, bias_l, gamma_l, beta_l, gmat)


# -------------------------- layout / param plumbing -------------------------- #

def _banded_conv_weight(w, W_out):
    """w: (Cout, Cin, kt, kh, kw) -> (kt, kh, (W_out+kw-1)*Cin, W_out*Cout).

    Folds the kw column taps into a banded (block-Toeplitz) matrix so each
    (dt, dh) tap is a single lane-dense 2-D matmul with no activation gather.
    """
    Cout, Cin, kt, kh, kw = w.shape
    eye = jnp.eye(W_out, dtype=w.dtype)
    taps_t = []
    for dtp in range(kt):
        taps_h = []
        for dh in range(kh):
            acc = jnp.zeros(((W_out + kw - 1) * Cin, W_out * Cout), w.dtype)
            for dw in range(kw):
                k = w[:, :, dtp, dh, dw].T                       # (Cin, Cout)
                bd = jnp.kron(eye, k)                            # (W*Cin, W*Cout)
                acc = acc + jnp.pad(bd, ((dw * Cin, (kw - 1 - dw) * Cin), (0, 0)))
            taps_h.append(acc)
        taps_t.append(jnp.stack(taps_h))
    return jnp.stack(taps_t)


def prepare_params(params, *, W, groups):
    """Built ONCE outside jit: banded weights, lane-tiled vectors, group matrix."""
    C = int(params["w1"].shape[0])

    def lane(v):                                             # (C,) -> (1, W*C)
        return jnp.tile(v, (W,)).reshape(1, W * C)

    ch = np.arange(W * C) % C
    gid = ch // (C // groups)
    gmat = jnp.asarray((gid[:, None] == gid[None, :]).astype(np.float32))

    return {
        "wb1": _banded_conv_weight(params["w1"], W).astype(jnp.bfloat16),
        "wb2": _banded_conv_weight(params["w2"], W).astype(jnp.bfloat16),
        "b1_l": lane(params["b1"]), "b2_l": lane(params["b2"]),
        "g1_l": lane(params["g1"]), "g2_l": lane(params["g2"]),
        "bt1_l": lane(params["bt1"]), "bt2_l": lane(params["bt2"]),
        "gmat": gmat,
    }


# --------------------------------- forward ----------------------------------- #

def temporal_aware_spatial_block(x, prep, groups=8, eps=1e-5):
    """x: [B, Cin, T, H, W] (NCTHW, like PyTorch) -> [B, Cout, T, H, W]."""
    B, Cin, T, H, W = x.shape
    WC = int(prep["b1_l"].shape[-1])
    C = WC // W
    Hp, Wp = H + 2, W + 2

    def strip(y):                                    # (B, L, W*C) -> (B, T, H, W, C)
        y = jnp.pad(y, ((0, 0), (0, T * Hp - y.shape[1]), (0, 0)))
        return y.reshape(B, T, Hp, W, C)[:, :, :H]

    # -- stage 1: conv3d_spatial (1,3,3), pad (0,1,1) + GN1 + SiLU (bf16 out) ----
    x_cl = jnp.transpose(x, (0, 2, 3, 4, 1)).astype(jnp.float32)     # (B,T,H,W,Cin)
    x1 = jnp.pad(x_cl, ((0, 0), (0, 0), (1, 1), (1, 1), (0, 0)))
    x1 = x1.reshape(B, T * Hp, Wp * Cin)
    h1 = _fused_conv_gn_silu(x1, prep["wb1"], prep["b1_l"], prep["g1_l"],
                             prep["bt1_l"], prep["gmat"],
                             T=T, H=H, Hp=Hp, groups=groups, eps=eps,
                             out_dtype=jnp.bfloat16)

    # -- stage 2: conv3d_temporal (3,3,3), pad (1,1,1) + GN2 + SiLU (f32 out) ----
    h1_cl = strip(h1)                                                 # bf16
    x2 = jnp.pad(h1_cl, ((0, 0), (1, 1), (1, 1), (1, 1), (0, 0)))
    x2 = x2.reshape(B, (T + 2) * Hp, Wp * C)
    out = _fused_conv_gn_silu(x2, prep["wb2"], prep["b2_l"], prep["g2_l"],
                              prep["bt2_l"], prep["gmat"],
                              T=T, H=H, Hp=Hp, groups=groups, eps=eps,
                              out_dtype=jnp.float32)

    out = strip(out)                                                  # (B,T,H,W,C)
    return jnp.transpose(out, (0, 4, 1, 2, 3))


# ------------------------ deterministic parameters --------------------------- #

def init_params(key, cin, cout, k=3):
    ks = jax.random.split(key, 8)
    fan1 = cin * 1 * k * k
    fan2 = cout * 3 * k * k
    b1 = 1.0 / np.sqrt(fan1)
    b2 = 1.0 / np.sqrt(fan2)
    return {
        "w1": jax.random.uniform(ks[0], (cout, cin, 1, k, k), jnp.float32, -b1, b1),
        "b1": jax.random.uniform(ks[1], (cout,), jnp.float32, -b1, b1),
        "w2": jax.random.uniform(ks[2], (cout, cout, 3, k, k), jnp.float32, -b2, b2),
        "b2": jax.random.uniform(ks[3], (cout,), jnp.float32, -b2, b2),
        "g1": 1.0 + 0.1 * jax.random.normal(ks[4], (cout,), jnp.float32),
        "bt1": 0.1 * jax.random.normal(ks[5], (cout,), jnp.float32),
        "g2": 1.0 + 0.1 * jax.random.normal(ks[6], (cout,), jnp.float32),
        "bt2": 0.1 * jax.random.normal(ks[7], (cout,), jnp.float32),
    }


# ---------------------------- pure-JAX reference ----------------------------- #

def ref_forward(x, params, groups=8, eps=1e-5):
    def conv3d(x, w, b, pad):
        out = jax.lax.conv_general_dilated(
            x, w, window_strides=(1, 1, 1), padding=pad,
            dimension_numbers=("NCDHW", "OIDHW", "NCDHW"))
        return out + b[None, :, None, None, None]

    def gn(x, gamma, beta):
        B, C, T, H, W = x.shape
        xg = x.reshape(B, groups, C // groups, T, H, W)
        mean = xg.mean(axis=(2, 3, 4, 5), keepdims=True)
        var = ((xg - mean) ** 2).mean(axis=(2, 3, 4, 5), keepdims=True)
        xn = ((xg - mean) / jnp.sqrt(var + eps)).reshape(B, C, T, H, W)
        return xn * gamma[None, :, None, None, None] + beta[None, :, None, None, None]

    h = conv3d(x, params["w1"], params["b1"], [(0, 0), (1, 1), (1, 1)])
    h = gn(h, params["g1"], params["bt1"])
    h = h * jax.nn.sigmoid(h)
    h = conv3d(h, params["w2"], params["b2"], [(1, 1), (1, 1), (1, 1)])
    h = gn(h, params["g2"], params["bt2"])
    h = h * jax.nn.sigmoid(h)
    return h


# ---------------------------------- main -------------------------------------- #

if __name__ == "__main__":
    key = jax.random.PRNGKey(0)
    kx, kp = jax.random.split(key)

    B, Cin, Cout, T, H, W = 2, 4, 16, 4, 8, 8
    x = jax.random.normal(kx, (B, Cin, T, H, W), jnp.float32)
    params = init_params(kp, Cin, Cout)

    # Banded weights / lane-tiled vectors / group matrix are prepared once, outside jit.
    prep = prepare_params(params, W=W, groups=8)

    fwd = jax.jit(temporal_aware_spatial_block)
    out = jax.block_until_ready(fwd(x, prep))

    ref = ref_forward(x, params)
    assert out.shape == (B, Cout, T, H, W), out.shape
    # Tolerance reflects bf16 MXU operands and the bf16 inter-stage activation;
    # accumulation, GroupNorm statistics and elementwise math are all f32.
    np.testing.assert_allclose(np.asarray(out), np.asarray(ref), atol=3e-2, rtol=3e-2)

    print("KERNEL_OK")
</pallas_src>

<mosaic_0001>
module attributes {stable_mosaic.version = 11 : i64} {
  func.func @_conv_gn_silu_kernel(%arg0: i32, %arg1: memref<1x40x40xf32, #tpu.memory_space<vmem>>, %arg2: memref<1x3x40x128xbf16, #tpu.memory_space<vmem>>, %arg3: memref<1x128xf32, #tpu.memory_space<vmem>>, %arg4: memref<1x128xf32, #tpu.memory_space<vmem>>, %arg5: memref<1x128xf32, #tpu.memory_space<vmem>>, %arg6: memref<128x128xf32, #tpu.memory_space<vmem>>, %arg7: memref<1x38x128xbf16, #tpu.memory_space<vmem>>) attributes {dimension_semantics = [#tpu.dimension_semantics<parallel>], iteration_bounds = array<i64: 2>, scalar_prefetch = 0 : i64, scratch_operands = 0 : i64, tpu.core_type = #tpu.core_type<tc>, window_params = [{transform_indices = @transform_0, window_bounds = array<i64: 1, 40, 40>}, {pipeline_mode = #tpu.pipeline_mode<synchronous>, transform_indices = @transform_1, window_bounds = array<i64: 1, 3, 40, 128>}, {pipeline_mode = #tpu.pipeline_mode<synchronous>, transform_indices = @transform_2, window_bounds = array<i64: 1, 128>}, {pipeline_mode = #tpu.pipeline_mode<synchronous>, transform_indices = @transform_3, window_bounds = array<i64: 1, 128>}, {pipeline_mode = #tpu.pipeline_mode<synchronous>, transform_indices = @transform_4, window_bounds = array<i64: 1, 128>}, {pipeline_mode = #tpu.pipeline_mode<synchronous>, transform_indices = @transform_5, window_bounds = array<i64: 128, 128>}, {transform_indices = @transform_6, window_bounds = array<i64: 1, 38, 128>}]} {
    %c0 = arith.constant 0 : index
    %c0_0 = arith.constant 0 : index
    %c0_1 = arith.constant 0 : index
    %0 = vector.load %arg1[%c0, %c0_0, %c0_1] : memref<1x40x40xf32, #tpu.memory_space<vmem>>, vector<1x40x40xf32>
    %1 = vector.shape_cast %0 : vector<1x40x40xf32> to vector<40x40xf32>
    %cst = arith.constant 0.000000e+00 : f32
    %2 = vector.broadcast %cst : f32 to vector<38x128xf32>
    %3 = vector.extract_strided_slice %1 {offsets = [0, 0], sizes = [38, 40], strides = [1, 1]} : vector<40x40xf32> to vector<38x40xf32>
    %4 = arith.truncf %3 : vector<38x40xf32> to vector<38x40xbf16>
    %c0_2 = arith.constant 0 : index
    %c0_3 = arith.constant 0 : index
    %c0_4 = arith.constant 0 : index
    %c0_5 = arith.constant 0 : index
    %5 = vector.load %arg2[%c0_2, %c0_3, %c0_4, %c0_5] : memref<1x3x40x128xbf16, #tpu.memory_space<vmem>>, vector<1x1x40x128xbf16>
    %6 = vector.shape_cast %5 : vector<1x1x40x128xbf16> to vector<40x128xbf16>
    %cst_6 = arith.constant dense<0.000000e+00> : vector<38x128xf32>
    %7 = tpu.matmul %4, %6, %cst_6 {dimension_numbers = #tpu.dot_dimension_numbers<[1], [0], [0], [1], [0, 0, 1, 1], [], []>} : vector<38x40xbf16>, vector<40x128xbf16>, vector<38x128xf32> -> vector<38x128xf32>
    %8 = arith.addf %2, %7 : vector<38x128xf32>
    %9 = vector.extract_strided_slice %1 {offsets = [1, 0], sizes = [38, 40], strides = [1, 1]} : vector<40x40xf32> to vector<38x40xf32>
    %10 = arith.truncf %9 : vector<38x40xf32> to vector<38x40xbf16>
    %c0_7 = arith.constant 0 : index
    %c1 = arith.constant 1 : index
    %c0_8 = arith.constant 0 : index
    %c0_9 = arith.constant 0 : index
    %11 = vector.load %arg2[%c0_7, %c1, %c0_8, %c0_9] : memref<1x3x40x128xbf16, #tpu.memory_space<vmem>>, vector<1x1x40x128xbf16>
    %12 = vector.shape_cast %11 : vector<1x1x40x128xbf16> to vector<40x128xbf16>
    %cst_10 = arith.constant dense<0.000000e+00> : vector<38x128xf32>
    %13 = tpu.matmul %10, %12, %cst_10 {dimension_numbers = #tpu.dot_dimension_numbers<[1], [0], [0], [1], [0, 0, 1, 1], [], []>} : vector<38x40xbf16>, vector<40x128xbf16>, vector<38x128xf32> -> vector<38x128xf32>
    %14 = arith.addf %8, %13 : vector<38x128xf32>
    %15 = vector.extract_strided_slice %1 {offsets = [2, 0], sizes = [38, 40], strides = [1, 1]} : vector<40x40xf32> to vector<38x40xf32>
    %16 = arith.truncf %15 : vector<38x40xf32> to vector<38x40xbf16>
    %c0_11 = arith.constant 0 : index
    %c2 = arith.constant 2 : index
    %c0_12 = arith.constant 0 : index
    %c0_13 = arith.constant 0 : index
    %17 = vector.load %arg2[%c0_11, %c2, %c0_12, %c0_13] : memref<1x3x40x128xbf16, #tpu.memory_space<vmem>>, vector<1x1x40x128xbf16>
    %18 = vector.shape_cast %17 : vector<1x1x40x128xbf16> to vector<40x128xbf16>
    %cst_14 = arith.constant dense<0.000000e+00> : vector<38x128xf32>
    %19 = tpu.matmul %16, %18, %cst_14 {dimension_numbers = #tpu.dot_dimension_numbers<[1], [0], [0], [1], [0, 0, 1, 1], [], []>} : vector<38x40xbf16>, vector<40x128xbf16>, vector<38x128xf32> -> vector<38x128xf32>
    %20 = arith.addf %14, %19 : vector<38x128xf32>
    %c0_15 = arith.constant 0 : index
    %c0_16 = arith.constant 0 : index
    %21 = vector.load %arg3[%c0_15, %c0_16] : memref<1x128xf32, #tpu.memory_space<vmem>>, vector<1x128xf32>
    %22 = vector.broadcast %21 : vector<1x128xf32> to vector<38x128xf32>
    %23 = arith.addf %20, %22 : vector<38x128xf32>
    %24 = tpu.iota {dimensions = array<i32: 0>} : vector<38x1xi32>
    %c10_i32 = arith.constant 10 : i32
    %c0_i32 = arith.constant 0 : i32
    %25 = arith.cmpi eq, %c10_i32, %c0_i32 : i32
    %c1_i32 = arith.constant 1 : i32
    %26 = arith.select %25, %c1_i32, %c10_i32 : i32
    %27 = vector.broadcast %26 : i32 to vector<38x1xi32>
    %28 = arith.remsi %24, %27 : vector<38x1xi32>
    %c0_i32_17 = arith.constant 0 : i32
    %29 = vector.broadcast %c0_i32_17 : i32 to vector<38x1xi32>
    %30 = arith.cmpi ne, %28, %29 : vector<38x1xi32>
    %c0_i32_18 = arith.constant 0 : i32
    %31 = vector.broadcast %c0_i32_18 : i32 to vector<38x1xi32>
    %32 = arith.cmpi slt, %28, %31 : vector<38x1xi32>
    %c0_i32_19 = arith.constant 0 : i32
    %33 = arith.cmpi slt, %26, %c0_i32_19 : i32
    %34 = vector.broadcast %33 : i1 to vector<38x1xi1>
    %35 = vector.broadcast %34 : vector<38x1xi1> to vector<38x1xi1>
    %36 = arith.xori %32, %35 : vector<38x1xi1>
    %37 = arith.andi %36, %30 : vector<38x1xi1>
    %38 = vector.broadcast %26 : i32 to vector<38x1xi32>
    %39 = arith.addi %28, %38 : vector<38x1xi32>
    %40 = arith.select %37, %39, %28 : vector<38x1xi1>, vector<38x1xi32>
    %c8_i32 = arith.constant 8 : i32
    %41 = vector.broadcast %c8_i32 : i32 to vector<38x1xi32>
    %42 = arith.cmpi slt, %40, %41 : vector<38x1xi32>
    %43 = arith.extui %42 : vector<38x1xi1> to vector<38x1xi32>
    %44 = arith.sitofp %43 : vector<38x1xi32> to vector<38x1xf32>
    %45 = vector.broadcast %44 : vector<38x1xf32> to vector<38x128xf32>
    %46 = arith.mulf %23, %45 : vector<38x128xf32>
    %cst_20 = arith.constant dense<0.000000e+00> : vector<128xf32>
    %47 = vector.multi_reduction <add>, %46, %cst_20 [0] : vector<38x128xf32> to vector<128xf32>
    %48 = vector.shape_cast %47 : vector<128xf32> to vector<1x128xf32>
    %c0_21 = arith.constant 0 : index
    %c0_22 = arith.constant 0 : index
    %49 = vector.load %arg6[%c0_21, %c0_22] : memref<128x128xf32, #tpu.memory_space<vmem>>, vector<128x128xf32>
    %cst_23 = arith.constant dense<0.000000e+00> : vector<1x128xf32>
    %50 = tpu.matmul %48, %49, %cst_23 {dimension_numbers = #tpu.dot_dimension_numbers<[1], [0], [0], [1], [0, 0, 1, 1], [], []>} : vector<1x128xf32>, vector<128x128xf32>, vector<1x128xf32> -> vector<1x128xf32>
    %cst_24 = arith.constant 0.001953125 : f32
    %51 = vector.broadcast %cst_24 : f32 to vector<1x128xf32>
    %52 = arith.mulf %50, %51 : vector<1x128xf32>
    %53 = vector.broadcast %52 : vector<1x128xf32> to vector<38x128xf32>
    %54 = arith.subf %23, %53 : vector<38x128xf32>
    %55 = vector.broadcast %44 : vector<38x1xf32> to vector<38x128xf32>
    %56 = arith.mulf %54, %55 : vector<38x128xf32>
    %57 = arith.mulf %56, %56 : vector<38x128xf32>
    %cst_25 = arith.constant dense<0.000000e+00> : vector<128xf32>
    %58 = vector.multi_reduction <add>, %57, %cst_25 [0] : vector<38x128xf32> to vector<128xf32>
    %59 = vector.shape_cast %58 : vector<128xf32> to vector<1x128xf32>
    %c0_26 = arith.constant 0 : index
    %c0_27 = arith.constant 0 : index
    %60 = vector.load %arg6[%c0_26, %c0_27] : memref<128x128xf32, #tpu.memory_space<vmem>>, vector<128x128xf32>
    %cst_28 = arith.constant dense<0.000000e+00> : vector<1x128xf32>
    %61 = tpu.matmul %59, %60, %cst_28 {dimension_numbers = #tpu.dot_dimension_numbers<[1], [0], [0], [1], [0, 0, 1, 1], [], []>} : vector<1x128xf32>, vector<128x128xf32>, vector<1x128xf32> -> vector<1x128xf32>
    %cst_29 = arith.constant 0.001953125 : f32
    %62 = vector.broadcast %cst_29 : f32 to vector<1x128xf32>
    %63 = arith.mulf %61, %62 : vector<1x128xf32>
    %c0_30 = arith.constant 0 : index
    %c0_31 = arith.constant 0 : index
    %64 = vector.load %arg4[%c0_30, %c0_31] : memref<1x128xf32, #tpu.memory_space<vmem>>, vector<1x128xf32>
    %cst_32 = arith.constant 9.99999974E-6 : f32
    %65 = vector.broadcast %cst_32 : f32 to vector<1x128xf32>
    %66 = arith.addf %63, %65 : vector<1x128xf32>
    %67 = math.rsqrt %66 : vector<1x128xf32>
    %68 = arith.mulf %64, %67 : vector<1x128xf32>
    %c0_33 = arith.constant 0 : index
    %c0_34 = arith.constant 0 : index
    %69 = vector.load %arg5[%c0_33, %c0_34] : memref<1x128xf32, #tpu.memory_space<vmem>>, vector<1x128xf32>
    %70 = arith.mulf %52, %68 : vector<1x128xf32>
    %71 = arith.subf %69, %70 : vector<1x128xf32>
    %72 = vector.broadcast %68 : vector<1x128xf32> to vector<38x128xf32>
    %73 = arith.mulf %23, %72 : vector<38x128xf32>
    %74 = vector.broadcast %71 : vector<1x128xf32> to vector<38x128xf32>
    %75 = arith.addf %73, %74 : vector<38x128xf32>
    %76 = arith.negf %75 : vector<38x128xf32>
    %77 = math.exp %76 : vector<38x128xf32>
    %cst_35 = arith.constant 1.000000e+00 : f32
    %78 = vector.broadcast %cst_35 : f32 to vector<38x128xf32>
    %79 = arith.addf %78, %77 : vector<38x128xf32>
    %80 = arith.divf %78, %79 : vector<38x128xf32>
    %81 = arith.mulf %75, %80 : vector<38x128xf32>
    %82 = arith.truncf %81 : vector<38x128xf32> to vector<38x128xbf16>
    %c0_36 = arith.constant 0 : index
    %c0_37 = arith.constant 0 : index
    %c0_38 = arith.constant 0 : index
    %83 = vector.load %arg7[%c0_36, %c0_37, %c0_38] : memref<1x38x128xbf16, #tpu.memory_space<vmem>>, vector<1x38x128xbf16>
    %84 = vector.shape_cast %83 : vector<1x38x128xbf16> to vector<38x128xbf16>
    %85 = vector.shape_cast %82 : vector<38x128xbf16> to vector<1x38x128xbf16>
    tpu.vector_store %arg7[%c0_36, %c0_37, %c0_38], %85 {strides = array<i32>} : memref<1x38x128xbf16, #tpu.memory_space<vmem>>, vector<1x38x128xbf16>,
    return
  }
  func.func @transform_0(%arg0: i32) -> (i32, i32, i32) {
    %c0_i32 = arith.constant 0 : i32
    %c0_i32_0 = arith.constant 0 : i32
    %c0_i32_1 = arith.constant 0 : i32
    return %arg0, %c0_i32, %c0_i32_0 : i32, i32, i32
  }
  func.func @transform_1(%arg0: i32) -> (i32, i32, i32, i32) {
    %c0_i32 = arith.constant 0 : i32
    %c0_i32_0 = arith.constant 0 : i32
    %c0_i32_1 = arith.constant 0 : i32
    %c0_i32_2 = arith.constant 0 : i32
    %c0_i32_3 = arith.constant 0 : i32
    return %c0_i32, %c0_i32_0, %c0_i32_1, %c0_i32_2 : i32, i32, i32, i32
  }
  func.func @transform_2(%arg0: i32) -> (i32, i32) {
    %c0_i32 = arith.constant 0 : i32
    %c0_i32_0 = arith.constant 0 : i32
    %c0_i32_1 = arith.constant 0 : i32
    return %c0_i32, %c0_i32_0 : i32, i32
  }
  func.func @transform_3(%arg0: i32) -> (i32, i32) {
    %c0_i32 = arith.constant 0 : i32
    %c0_i32_0 = arith.constant 0 : i32
    %c0_i32_1 = arith.constant 0 : i32
    return %c0_i32, %c0_i32_0 : i32, i32
  }
  func.func @transform_4(%arg0: i32) -> (i32, i32) {
    %c0_i32 = arith.constant 0 : i32
    %c0_i32_0 = arith.constant 0 : i32
    %c0_i32_1 = arith.constant 0 : i32
    return %c0_i32, %c0_i32_0 : i32, i32
  }
  func.func @transform_5(%arg0: i32) -> (i32, i32) {
    %c0_i32 = arith.constant 0 : i32
    %c0_i32_0 = arith.constant 0 : i32
    %c0_i32_1 = arith.constant 0 : i32
    return %c0_i32, %c0_i32_0 : i32, i32
  }
  func.func @transform_6(%arg0: i32) -> (i32, i32, i32) {
    %c0_i32 = arith.constant 0 : i32
    %c0_i32_0 = arith.constant 0 : i32
    %c0_i32_1 = arith.constant 0 : i32
    return %arg0, %c0_i32, %c0_i32_0 : i32, i32, i32
  }
}

module attributes {stable_mosaic.version = 11 : i64} {
  func.func @_conv_gn_silu_kernel(%arg0: i32, %arg1: memref<1x60x160xbf16, #tpu.memory_space<vmem>>, %arg2: memref<3x3x160x128xbf16, #tpu.memory_space<vmem>>, %arg3: memref<1x128xf32, #tpu.memory_space<vmem>>, %arg4: memref<1x128xf32, #tpu.memory_space<vmem>>, %arg5: memref<1x128xf32, #tpu.memory_space<vmem>>, %arg6: memref<128x128xf32, #tpu.memory_space<vmem>>, %arg7: memref<1x38x128xf32, #tpu.memory_space<vmem>>) attributes {dimension_semantics = [#tpu.dimension_semantics<parallel>], iteration_bounds = array<i64: 2>, scalar_prefetch = 0 : i64, scratch_operands = 0 : i64, tpu.core_type = #tpu.core_type<tc>, window_params = [{transform_indices = @transform_0, window_bounds = array<i64: 1, 60, 160>}, {pipeline_mode = #tpu.pipeline_mode<synchronous>, transform_indices = @transform_1, window_bounds = array<i64: 3, 3, 160, 128>}, {pipeline_mode = #tpu.pipeline_mode<synchronous>, transform_indices = @transform_2, window_bounds = array<i64: 1, 128>}, {pipeline_mode = #tpu.pipeline_mode<synchronous>, transform_indices = @transform_3, window_bounds = array<i64: 1, 128>}, {pipeline_mode = #tpu.pipeline_mode<synchronous>, transform_indices = @transform_4, window_bounds = array<i64: 1, 128>}, {pipeline_mode = #tpu.pipeline_mode<synchronous>, transform_indices = @transform_5, window_bounds = array<i64: 128, 128>}, {transform_indices = @transform_6, window_bounds = array<i64: 1, 38, 128>}]} {
    %c0 = arith.constant 0 : index
    %c0_0 = arith.constant 0 : index
    %c0_1 = arith.constant 0 : index
    %0 = vector.load %arg1[%c0, %c0_0, %c0_1] : memref<1x60x160xbf16, #tpu.memory_space<vmem>>, vector<1x60x160xbf16>
    %1 = vector.shape_cast %0 : vector<1x60x160xbf16> to vector<60x160xbf16>
    %2 = arith.extf %1 : vector<60x160xbf16> to vector<60x160xf32>
    %cst = arith.constant 0.000000e+00 : f32
    %3 = vector.broadcast %cst : f32 to vector<38x128xf32>
    %4 = vector.extract_strided_slice %2 {offsets = [0, 0], sizes = [38, 160], strides = [1, 1]} : vector<60x160xf32> to vector<38x160xf32>
    %5 = arith.truncf %4 : vector<38x160xf32> to vector<38x160xbf16>
    %c0_2 = arith.constant 0 : index
    %c0_3 = arith.constant 0 : index
    %c0_4 = arith.constant 0 : index
    %c0_5 = arith.constant 0 : index
    %6 = vector.load %arg2[%c0_2, %c0_3, %c0_4, %c0_5] : memref<3x3x160x128xbf16, #tpu.memory_space<vmem>>, vector<1x1x160x128xbf16>
    %7 = vector.shape_cast %6 : vector<1x1x160x128xbf16> to vector<160x128xbf16>
    %cst_6 = arith.constant dense<0.000000e+00> : vector<38x128xf32>
    %8 = tpu.matmul %5, %7, %cst_6 {dimension_numbers = #tpu.dot_dimension_numbers<[1], [0], [0], [1], [0, 0, 1, 1], [], []>} : vector<38x160xbf16>, vector<160x128xbf16>, vector<38x128xf32> -> vector<38x128xf32>
    %9 = arith.addf %3, %8 : vector<38x128xf32>
    %10 = vector.extract_strided_slice %2 {offsets = [1, 0], sizes = [38, 160], strides = [1, 1]} : vector<60x160xf32> to vector<38x160xf32>
    %11 = arith.truncf %10 : vector<38x160xf32> to vector<38x160xbf16>
    %c0_7 = arith.constant 0 : index
    %c1 = arith.constant 1 : index
    %c0_8 = arith.constant 0 : index
    %c0_9 = arith.constant 0 : index
    %12 = vector.load %arg2[%c0_7, %c1, %c0_8, %c0_9] : memref<3x3x160x128xbf16, #tpu.memory_space<vmem>>, vector<1x1x160x128xbf16>
    %13 = vector.shape_cast %12 : vector<1x1x160x128xbf16> to vector<160x128xbf16>
    %cst_10 = arith.constant dense<0.000000e+00> : vector<38x128xf32>
    %14 = tpu.matmul %11, %13, %cst_10 {dimension_numbers = #tpu.dot_dimension_numbers<[1], [0], [0], [1], [0, 0, 1, 1], [], []>} : vector<38x160xbf16>, vector<160x128xbf16>, vector<38x128xf32> -> vector<38x128xf32>
    %15 = arith.addf %9, %14 : vector<38x128xf32>
    %16 = vector.extract_strided_slice %2 {offsets = [2, 0], sizes = [38, 160], strides = [1, 1]} : vector<60x160xf32> to vector<38x160xf32>
    %17 = arith.truncf %16 : vector<38x160xf32> to vector<38x160xbf16>
    %c0_11 = arith.constant 0 : index
    %c2 = arith.constant 2 : index
    %c0_12 = arith.constant 0 : index
    %c0_13 = arith.constant 0 : index
    %18 = vector.load %arg2[%c0_11, %c2, %c0_12, %c0_13] : memref<3x3x160x128xbf16, #tpu.memory_space<vmem>>, vector<1x1x160x128xbf16>
    %19 = vector.shape_cast %18 : vector<1x1x160x128xbf16> to vector<160x128xbf16>
    %cst_14 = arith.constant dense<0.000000e+00> : vector<38x128xf32>
    %20 = tpu.matmul %17, %19, %cst_14 {dimension_numbers = #tpu.dot_dimension_numbers<[1], [0], [0], [1], [0, 0, 1, 1], [], []>} : vector<38x160xbf16>, vector<160x128xbf16>, vector<38x128xf32> -> vector<38x128xf32>
    %21 = arith.addf %15, %20 : vector<38x128xf32>
    %22 = vector.extract_strided_slice %2 {offsets = [10, 0], sizes = [38, 160], strides = [1, 1]} : vector<60x160xf32> to vector<38x160xf32>
    %23 = arith.truncf %22 : vector<38x160xf32> to vector<38x160xbf16>
    %c1_15 = arith.constant 1 : index
    %c0_16 = arith.constant 0 : index
    %c0_17 = arith.constant 0 : index
    %c0_18 = arith.constant 0 : index
    %24 = vector.load %arg2[%c1_15, %c0_16, %c0_17, %c0_18] : memref<3x3x160x128xbf16, #tpu.memory_space<vmem>>, vector<1x1x160x128xbf16>
    %25 = vector.shape_cast %24 : vector<1x1x160x128xbf16> to vector<160x128xbf16>
    %cst_19 = arith.constant dense<0.000000e+00> : vector<38x128xf32>
    %26 = tpu.matmul %23, %25, %cst_19 {dimension_numbers = #tpu.dot_dimension_numbers<[1], [0], [0], [1], [0, 0, 1, 1], [], []>} : vector<38x160xbf16>, vector<160x128xbf16>, vector<38x128xf32> -> vector<38x128xf32>
    %27 = arith.addf %21, %26 : vector<38x128xf32>
    %28 = vector.extract_strided_slice %2 {offsets = [11, 0], sizes = [38, 160], strides = [1, 1]} : vector<60x160xf32> to vector<38x160xf32>
    %29 = arith.truncf %28 : vector<38x160xf32> to vector<38x160xbf16>
    %c1_20 = arith.constant 1 : index
    %c1_21 = arith.constant 1 : index
    %c0_22 = arith.constant 0 : index
    %c0_23 = arith.constant 0 : index
    %30 = vector.load %arg2[%c1_20, %c1_21, %c0_22, %c0_23] : memref<3x3x160x128xbf16, #tpu.memory_space<vmem>>, vector<1x1x160x128xbf16>
    %31 = vector.shape_cast %30 : vector<1x1x160x128xbf16> to vector<160x128xbf16>
    %cst_24 = arith.constant dense<0.000000e+00> : vector<38x128xf32>
    %32 = tpu.matmul %29, %31, %cst_24 {dimension_numbers = #tpu.dot_dimension_numbers<[1], [0], [0], [1], [0, 0, 1, 1], [], []>} : vector<38x160xbf16>, vector<160x128xbf16>, vector<38x128xf32> -> vector<38x128xf32>
    %33 = arith.addf %27, %32 : vector<38x128xf32>
    %34 = vector.extract_strided_slice %2 {offsets = [12, 0], sizes = [38, 160], strides = [1, 1]} : vector<60x160xf32> to vector<38x160xf32>
    %35 = arith.truncf %34 : vector<38x160xf32> to vector<38x160xbf16>
    %c1_25 = arith.constant 1 : index
    %c2_26 = arith.constant 2 : index
    %c0_27 = arith.constant 0 : index
    %c0_28 = arith.constant 0 : index
    %36 = vector.load %arg2[%c1_25, %c2_26, %c0_27, %c0_28] : memref<3x3x160x128xbf16, #tpu.memory_space<vmem>>, vector<1x1x160x128xbf16>
    %37 = vector.shape_cast %36 : vector<1x1x160x128xbf16> to vector<160x128xbf16>
    %cst_29 = arith.constant dense<0.000000e+00> : vector<38x128xf32>
    %38 = tpu.matmul %35, %37, %cst_29 {dimension_numbers = #tpu.dot_dimension_numbers<[1], [0], [0], [1], [0, 0, 1, 1], [], []>} : vector<38x160xbf16>, vector<160x128xbf16>, vector<38x128xf32> -> vector<38x128xf32>
    %39 = arith.addf %33, %38 : vector<38x128xf32>
    %40 = vector.extract_strided_slice %2 {offsets = [20, 0], sizes = [38, 160], strides = [1, 1]} : vector<60x160xf32> to vector<38x160xf32>
    %41 = arith.truncf %40 : vector<38x160xf32> to vector<38x160xbf16>
    %c2_30 = arith.constant 2 : index
    %c0_31 = arith.constant 0 : index
    %c0_32 = arith.constant 0 : index
    %c0_33 = arith.constant 0 : index
    %42 = vector.load %arg2[%c2_30, %c0_31, %c0_32, %c0_33] : memref<3x3x160x128xbf16, #tpu.memory_space<vmem>>, vector<1x1x160x128xbf16>
    %43 = vector.shape_cast %42 : vector<1x1x160x128xbf16> to vector<160x128xbf16>
    %cst_34 = arith.constant dense<0.000000e+00> : vector<38x128xf32>
    %44 = tpu.matmul %41, %43, %cst_34 {dimension_numbers = #tpu.dot_dimension_numbers<[1], [0], [0], [1], [0, 0, 1, 1], [], []>} : vector<38x160xbf16>, vector<160x128xbf16>, vector<38x128xf32> -> vector<38x128xf32>
    %45 = arith.addf %39, %44 : vector<38x128xf32>
    %46 = vector.extract_strided_slice %2 {offsets = [21, 0], sizes = [38, 160], strides = [1, 1]} : vector<60x160xf32> to vector<38x160xf32>
    %47 = arith.truncf %46 : vector<38x160xf32> to vector<38x160xbf16>
    %c2_35 = arith.constant 2 : index
    %c1_36 = arith.constant 1 : index
    %c0_37 = arith.constant 0 : index
    %c0_38 = arith.constant 0 : index
    %48 = vector.load %arg2[%c2_35, %c1_36, %c0_37, %c0_38] : memref<3x3x160x128xbf16, #tpu.memory_space<vmem>>, vector<1x1x160x128xbf16>
    %49 = vector.shape_cast %48 : vector<1x1x160x128xbf16> to vector<160x128xbf16>
    %cst_39 = arith.constant dense<0.000000e+00> : vector<38x128xf32>
    %50 = tpu.matmul %47, %49, %cst_39 {dimension_numbers = #tpu.dot_dimension_numbers<[1], [0], [0], [1], [0, 0, 1, 1], [], []>} : vector<38x160xbf16>, vector<160x128xbf16>, vector<38x128xf32> -> vector<38x128xf32>
    %51 = arith.addf %45, %50 : vector<38x128xf32>
    %52 = vector.extract_strided_slice %2 {offsets = [22, 0], sizes = [38, 160], strides = [1, 1]} : vector<60x160xf32> to vector<38x160xf32>
    %53 = arith.truncf %52 : vector<38x160xf32> to vector<38x160xbf16>
    %c2_40 = arith.constant 2 : index
    %c2_41 = arith.constant 2 : index
    %c0_42 = arith.constant 0 : index
    %c0_43 = arith.constant 0 : index
    %54 = vector.load %arg2[%c2_40, %c2_41, %c0_42, %c0_43] : memref<3x3x160x128xbf16, #tpu.memory_space<vmem>>, vector<1x1x160x128xbf16>
    %55 = vector.shape_cast %54 : vector<1x1x160x128xbf16> to vector<160x128xbf16>
    %cst_44 = arith.constant dense<0.000000e+00> : vector<38x128xf32>
    %56 = tpu.matmul %53, %55, %cst_44 {dimension_numbers = #tpu.dot_dimension_numbers<[1], [0], [0], [1], [0, 0, 1, 1], [], []>} : vector<38x160xbf16>, vector<160x128xbf16>, vector<38x128xf32> -> vector<38x128xf32>
    %57 = arith.addf %51, %56 : vector<38x128xf32>
    %c0_45 = arith.constant 0 : index
    %c0_46 = arith.constant 0 : index
    %58 = vector.load %arg3[%c0_45, %c0_46] : memref<1x128xf32, #tpu.memory_space<vmem>>, vector<1x128xf32>
    %59 = vector.broadcast %58 : vector<1x128xf32> to vector<38x128xf32>
    %60 = arith.addf %57, %59 : vector<38x128xf32>
    %61 = tpu.iota {dimensions = array<i32: 0>} : vector<38x1xi32>
    %c10_i32 = arith.constant 10 : i32
    %c0_i32 = arith.constant 0 : i32
    %62 = arith.cmpi eq, %c10_i32, %c0_i32 : i32
    %c1_i32 = arith.constant 1 : i32
    %63 = arith.select %62, %c1_i32, %c10_i32 : i32
    %64 = vector.broadcast %63 : i32 to vector<38x1xi32>
    %65 = arith.remsi %61, %64 : vector<38x1xi32>
    %c0_i32_47 = arith.constant 0 : i32
    %66 = vector.broadcast %c0_i32_47 : i32 to vector<38x1xi32>
    %67 = arith.cmpi ne, %65, %66 : vector<38x1xi32>
    %c0_i32_48 = arith.constant 0 : i32
    %68 = vector.broadcast %c0_i32_48 : i32 to vector<38x1xi32>
    %69 = arith.cmpi slt, %65, %68 : vector<38x1xi32>
    %c0_i32_49 = arith.constant 0 : i32
    %70 = arith.cmpi slt, %63, %c0_i32_49 : i32
    %71 = vector.broadcast %70 : i1 to vector<38x1xi1>
    %72 = vector.broadcast %71 : vector<38x1xi1> to vector<38x1xi1>
    %73 = arith.xori %69, %72 : vector<38x1xi1>
    %74 = arith.andi %73, %67 : vector<38x1xi1>
    %75 = vector.broadcast %63 : i32 to vector<38x1xi32>
    %76 = arith.addi %65, %75 : vector<38x1xi32>
    %77 = arith.select %74, %76, %65 : vector<38x1xi1>, vector<38x1xi32>
    %c8_i32 = arith.constant 8 : i32
    %78 = vector.broadcast %c8_i32 : i32 to vector<38x1xi32>
    %79 = arith.cmpi slt, %77, %78 : vector<38x1xi32>
    %80 = arith.extui %79 : vector<38x1xi1> to vector<38x1xi32>
    %81 = arith.sitofp %80 : vector<38x1xi32> to vector<38x1xf32>
    %82 = vector.broadcast %81 : vector<38x1xf32> to vector<38x128xf32>
    %83 = arith.mulf %60, %82 : vector<38x128xf32>
    %cst_50 = arith.constant dense<0.000000e+00> : vector<128xf32>
    %84 = vector.multi_reduction <add>, %83, %cst_50 [0] : vector<38x128xf32> to vector<128xf32>
    %85 = vector.shape_cast %84 : vector<128xf32> to vector<1x128xf32>
    %c0_51 = arith.constant 0 : index
    %c0_52 = arith.constant 0 : index
    %86 = vector.load %arg6[%c0_51, %c0_52] : memref<128x128xf32, #tpu.memory_space<vmem>>, vector<128x128xf32>
    %cst_53 = arith.constant dense<0.000000e+00> : vector<1x128xf32>
    %87 = tpu.matmul %85, %86, %cst_53 {dimension_numbers = #tpu.dot_dimension_numbers<[1], [0], [0], [1], [0, 0, 1, 1], [], []>} : vector<1x128xf32>, vector<128x128xf32>, vector<1x128xf32> -> vector<1x128xf32>
    %cst_54 = arith.constant 0.001953125 : f32
    %88 = vector.broadcast %cst_54 : f32 to vector<1x128xf32>
    %89 = arith.mulf %87, %88 : vector<1x128xf32>
    %90 = vector.broadcast %89 : vector<1x128xf32> to vector<38x128xf32>
    %91 = arith.subf %60, %90 : vector<38x128xf32>
    %92 = vector.broadcast %81 : vector<38x1xf32> to vector<38x128xf32>
    %93 = arith.mulf %91, %92 : vector<38x128xf32>
    %94 = arith.mulf %93, %93 : vector<38x128xf32>
    %cst_55 = arith.constant dense<0.000000e+00> : vector<128xf32>
    %95 = vector.multi_reduction <add>, %94, %cst_55 [0] : vector<38x128xf32> to vector<128xf32>
    %96 = vector.shape_cast %95 : vector<128xf32> to vector<1x128xf32>
    %c0_56 = arith.constant 0 : index
    %c0_57 = arith.constant 0 : index
    %97 = vector.load %arg6[%c0_56, %c0_57] : memref<128x128xf32, #tpu.memory_space<vmem>>, vector<128x128xf32>
    %cst_58 = arith.constant dense<0.000000e+00> : vector<1x128xf32>
    %98 = tpu.matmul %96, %97, %cst_58 {dimension_numbers = #tpu.dot_dimension_numbers<[1], [0], [0], [1], [0, 0, 1, 1], [], []>} : vector<1x128xf32>, vector<128x128xf32>, vector<1x128xf32> -> vector<1x128xf32>
    %cst_59 = arith.constant 0.001953125 : f32
    %99 = vector.broadcast %cst_59 : f32 to vector<1x128xf32>
    %100 = arith.mulf %98, %99 : vector<1x128xf32>
    %c0_60 = arith.constant 0 : index
    %c0_61 = arith.constant 0 : index
    %101 = vector.load %arg4[%c0_60, %c0_61] : memref<1x128xf32, #tpu.memory_space<vmem>>, vector<1x128xf32>
    %cst_62 = arith.constant 9.99999974E-6 : f32
    %102 = vector.broadcast %cst_62 : f32 to vector<1x128xf32>
    %103 = arith.addf %100, %102 : vector<1x128xf32>
    %104 = math.rsqrt %103 : vector<1x128xf32>
    %105 = arith.mulf %101, %104 : vector<1x128xf32>
    %c0_63 = arith.constant 0 : index
    %c0_64 = arith.constant 0 : index
    %106 = vector.load %arg5[%c0_63, %c0_64] : memref<1x128xf32, #tpu.memory_space<vmem>>, vector<1x128xf32>
    %107 = arith.mulf %89, %105 : vector<1x128xf32>
    %108 = arith.subf %106, %107 : vector<1x128xf32>
    %109 = vector.broadcast %105 : vector<1x128xf32> to vector<38x128xf32>
    %110 = arith.mulf %60, %109 : vector<38x128xf32>
    %111 = vector.broadcast %108 : vector<1x128xf32> to vector<38x128xf32>
    %112 = arith.addf %110, %111 : vector<38x128xf32>
    %113 = arith.negf %112 : vector<38x128xf32>
    %114 = math.exp %113 : vector<38x128xf32>
    %cst_65 = arith.constant 1.000000e+00 : f32
    %115 = vector.broadcast %cst_65 : f32 to vector<38x128xf32>
    %116 = arith.addf %115, %114 : vector<38x128xf32>
    %117 = arith.divf %115, %116 : vector<38x128xf32>
    %118 = arith.mulf %112, %117 : vector<38x128xf32>
    %c0_66 = arith.constant 0 : index
    %c0_67 = arith.constant 0 : index
    %c0_68 = arith.constant 0 : index
    %119 = vector.load %arg7[%c0_66, %c0_67, %c0_68] : memref<1x38x128xf32, #tpu.memory_space<vmem>>, vector<1x38x128xf32>
    %120 = vector.shape_cast %119 : vector<1x38x128xf32> to vector<38x128xf32>
    %121 = vector.shape_cast %118 : vector<38x128xf32> to vector<1x38x128xf32>
    tpu.vector_store %arg7[%c0_66, %c0_67, %c0_68], %121 {strides = array<i32>} : memref<1x38x128xf32, #tpu.memory_space<vmem>>, vector<1x38x128xf32>,
    return
  }
  func.func @transform_0(%arg0: i32) -> (i32, i32, i32) {
    %c0_i32 = arith.constant 0 : i32
    %c0_i32_0 = arith.constant 0 : i32
    %c0_i32_1 = arith.constant 0 : i32
    return %arg0, %c0_i32, %c0_i32_0 : i32, i32, i32
  }
  func.func @transform_1(%arg0: i32) -> (i32, i32, i32, i32) {
    %c0_i32 = arith.constant 0 : i32
    %c0_i32_0 = arith.constant 0 : i32
    %c0_i32_1 = arith.constant 0 : i32
    %c0_i32_2 = arith.constant 0 : i32
    %c0_i32_3 = arith.constant 0 : i32
    return %c0_i32, %c0_i32_0, %c0_i32_1, %c0_i32_2 : i32, i32, i32, i32
  }
  func.func @transform_2(%arg0: i32) -> (i32, i32) {
    %c0_i32 = arith.constant 0 : i32
    %c0_i32_0 = arith.constant 0 : i32
    %c0_i32_1 = arith.constant 0 : i32
    return %c0_i32, %c0_i32_0 : i32, i32
  }
  func.func @transform_3(%arg0: i32) -> (i32, i32) {
    %c0_i32 = arith.constant 0 : i32
    %c0_i32_0 = arith.constant 0 : i32
    %c0_i32_1 = arith.constant 0 : i32
    return %c0_i32, %c0_i32_0 : i32, i32
  }
  func.func @transform_4(%arg0: i32) -> (i32, i32) {
    %c0_i32 = arith.constant 0 : i32
    %c0_i32_0 = arith.constant 0 : i32
    %c0_i32_1 = arith.constant 0 : i32
    return %c0_i32, %c0_i32_0 : i32, i32
  }
  func.func @transform_5(%arg0: i32) -> (i32, i32) {
    %c0_i32 = arith.constant 0 : i32
    %c0_i32_0 = arith.constant 0 : i32
    %c0_i32_1 = arith.constant 0 : i32
    return %c0_i32, %c0_i32_0 : i32, i32
  }
  func.func @transform_6(%arg0: i32) -> (i32, i32, i32) {
    %c0_i32 = arith.constant 0 : i32
    %c0_i32_0 = arith.constant 0 : i32
    %c0_i32_1 = arith.constant 0 : i32
    return %arg0, %c0_i32, %c0_i32_0 : i32, i32, i32
  }
}

</mosaic_0001>

<bundles_post_ra>
// kernel: temporal_aware_spatial_block.2
= control target key start
LH: loop header
LB: loop body
LE: loop exit
PB: predicated region body
PF: predicated region fallthrough
CT: control target
= control target key end

     0   :  { %s1426_s21 = smov 0   ;;  %s1679_s0 = inlined_call_operand.vmem [shape: f32[2,40,40], index: 0, kind: input, shape index: {}]   ;;  %s1680_s1 = inlined_call_operand.vmem [shape: bf16[1,3,40,128], index: 1, kind: input, shape index: {}]   ;;  %s1681_s2 = inlined_call_operand.vmem [shape: f32[1,128], index: 2, kind: input, shape index: {}]   ;;  %s1682_s3 = inlined_call_operand.vmem [shape: f32[1,128], index: 3, kind: input, shape index: {}]   ;;  %s1683_s4 = inlined_call_operand.vmem [shape: f32[1,128], index: 4, kind: input, shape index: {}]   ;;  %s1684_s5 = inlined_call_operand.vmem [shape: f32[128,128], index: 5, kind: input, shape index: {}]   ;;  %s1685_s6 = inlined_call_operand.vmem [shape: bf16[2,38,128], index: 6, kind: output, shape index: {}]  }
   0x1 LB: > { %s1027_s22 = sadd.s32 4294967295, %s1386_s21   ;;  %p1031_p0 = scmp.ge.s32.totalorder %s1386_s21, 1  ;;  %s1386_s21 = sphi %s1426_s21, %s16_s21  }
   0x2   : > { %p212_p1 = scmp.lt.s32.totalorder %s1386_s21, 3 }
   0x4   : > { %p213_p2 = pnand %p1031_p0, %p212_p1 }
   0x5   : > { %v1349_v0 = vld [vmem:[%s1680_s1 + $0x14] sm:$0xff] (!%p213_p2)   ;;  %v1388_v1 = vmov (!%p213_p2), 0.0   ;;  %v1350_v2 = vld [vmem:[%s1680_s1 + $0x1c] sm:$0xff] (!%p213_p2)   ;;  %p242_p3 = scmp.lt.s32.totalorder (!%p213_p2), %s1027_s22, 1  ;;  %v1351_v3 = vld [vmem:[%s1680_s1 + $0x24] ss:$0 sps:$4 sm:$0xff] (!%p213_p2)  }
   0x6   : > { %216 = sbr.rel (%p213_p2) target bundleno = 807 (0x327), region = 44  ;;  %1320 = vmatprep.subr.bf16.mxu1 (!%p213_p2), %v1388_v1  ;;  %1148 = vmatprep.subr.bf16.mxu0 (!%p213_p2), %v1388_v1  ;;  %vm321_vm0 = vcmask (!%p213_p2), 1043456   ;;  %vm1389_vm1 = vmmov (!%p213_p2), 0   ;;  %vm311_vm2 = vcmask (!%p213_p2), 326656   ;;  %v1352_v20 = vld [vmem:[%s1680_s1] sm:$0xff] (!%p213_p2)   ;;  %v1353_v24 = vld [vmem:[%s1680_s1 + $0x28] sm:$0xff] (!%p213_p2)  }
   0x7   : > { %1323 = vmatpush3.bf16.msra.mxu1 (!%p213_p2), %v1349_v0  ;;  %1149 = vmatpush3.bf16.msra.mxu0 (!%p213_p2), %v1349_v0  ;;  %v323_v4 = vsel (!%p213_p2), %vm321_vm0, %v1351_v3, 0  ;;  %vm272_vm3 = vsmask.f32 (!%p213_p2), 7424  ;;  %v1354_v27 = vld [vmem:[%s1680_s1 + $0x8] sm:$0xff] (!%p213_p2)   ;;  %v1355_v28 = vld [vmem:[%s1680_s1 + $0x30] sm:$0xff] (!%p213_p2)   ;;  %vm470_vm4 = vcmask (!%p213_p2), 1046528  }
   0x8   : > { %1321 = vmatprep.subr.bf16.mxu1 (!%p213_p2), %v1388_v1  ;;  %1150 = vmatprep.subr.bf16.mxu0 (!%p213_p2), %v1388_v1  ;;  %v1356_v29 = vld [vmem:[%s1680_s1 + $0x10] ss:$0 sps:$4 sm:$0xff] (!%p213_p2)   ;;  %v1357_v31 = vld [vmem:[%s1680_s1 + $0x38] ss:$0 sps:$4 sm:$0xff] (!%p213_p2)   ;;  %v694_v40 = vld [vmem:[%s1684_s5] sm:$0xff] (!%p213_p2)  ;;  %v1390_v43 = vmov (!%p213_p2), 0.0|0.0  }
   0x9   : > { %1162 = vmatprep.mubr.msk.bf16.mxu1 (!%p213_p2), %vm1389_vm1, %v1388_v1  ;;  %1154 = vmatprep.mubr.msk.bf16.mxu0 (!%p213_p2), %vm1389_vm1, %v1388_v1  ;;  %v403_v32 = vsel (!%p213_p2), %vm321_vm0, %v1356_v29, 0  ;;  %v501_v34 = vsel (!%p213_p2), %vm321_vm0, %v1357_v31, 0  ;;  %v695_v41 = vld [vmem:[%s1684_s5 + $0x8] sm:$0xff] (!%p213_p2)  ;;  %v696_v44 = vld [vmem:[%s1684_s5 + $0x10] sm:$0xff] (!%p213_p2)  ;;  %v697_v45 = vld [vmem:[%s1684_s5 + $0x18] sm:$0xff] (!%p213_p2) }
   0xa   : > { %v1273_v42 = vpack.c.bf16 (!%p213_p2), %v695_v41, %v694_v40  ;;  %v1276_v46 = vpack.c.bf16 (!%p213_p2), %v697_v45, %v696_v44  ;;  %v698_v47 = vld [vmem:[%s1684_s5 + $0x20] sm:$0xff] (!%p213_p2)  ;;  %v699_v48 = vld [vmem:[%s1684_s5 + $0x28] sm:$0xff] (!%p213_p2)  ;;  %v700_v50 = vld [vmem:[%s1684_s5 + $0x30] sm:$0xff] (!%p213_p2) }
   0xb   : > { %1324 = vmatpush3.bf16.msra.mxu1 (!%p213_p2), %v1350_v2  ;;  %1151 = vmatpush3.bf16.msra.mxu0 (!%p213_p2), %v1350_v2  ;;  %v1279_v49 = vpack.c.bf16 (!%p213_p2), %v699_v48, %v698_v47  ;;  %v701_v51 = vld [vmem:[%s1684_s5 + $0x38] sm:$0xff] (!%p213_p2)  ;;  %v702_v53 = vld [vmem:[%s1684_s5 + $0x40] sm:$0xff] (!%p213_p2)  ;;  %v703_v54 = vld [vmem:[%s1684_s5 + $0x48] sm:$0xff] (!%p213_p2)  ;;  %v576_v2 = vlaneseq (!%p213_p2) }
   0xc   : > { %1322 = vmatprep.subr.bf16.mxu1 (!%p213_p2), %v1388_v1  ;;  %1152 = vmatprep.subr.bf16.mxu0 (!%p213_p2), %v1388_v1  ;;  %v1282_v52 = vpack.c.bf16 (!%p213_p2), %v701_v51, %v700_v50  ;;  %v1285_v55 = vpack.c.bf16 (!%p213_p2), %v703_v54, %v702_v53  ;;  %v704_v56 = vld [vmem:[%s1684_s5 + $0x50] sm:$0xff] (!%p213_p2)  ;;  %v705_v57 = vld [vmem:[%s1684_s5 + $0x58] sm:$0xff] (!%p213_p2)  ;;  %v706_v59 = vld [vmem:[%s1684_s5 + $0x60] sm:$0xff] (!%p213_p2) }
   0xd   : > { %s1697_s22 = smov (!%p242_p3, %s1027_s22), 1  ;;  %v1288_v58 = vpack.c.bf16 %v705_v57, %v704_v56  ;;  %v707_v60 = vld [vmem:[%s1684_s5 + $0x68] sm:$0xff]  ;;  %v708_v62 = vld [vmem:[%s1684_s5 + $0x70] sm:$0xff]  ;;  %v709_v63 = vld [vmem:[%s1684_s5 + $0x78] sm:$0xff]  ;;  %v1569_v3 = vshrl.u32 %v576_v2, 7 }
   0xe   : > { %s1326_s29 = smul.u32 40, %s1697_s22  ;;  %v1291_v61 = vpack.c.bf16 %v707_v60, %v706_v59  ;;  %v1294_v0 = vpack.c.bf16 %v709_v63, %v708_v62 }
   0xf   : > { %1325 = vmatpush3.bf16.msra.mxu1 %v323_v4  ;;  %1153 = vmatpush3.bf16.msra.mxu0 %v323_v4  ;;  %v578_v4 = vadd.s32 8, %v1569_v3  ;;  %s1327_s15 = smul.u32 20, %s1697_s22 }
  0x10   : > { %s246_s8 = scalar_lea.vmem %s1679_s0, %s1326_s29  ;;  %1166 = vmatprep.subr.bf16.mxu1 %v1388_v1  ;;  %1184 = vmatprep.subr.bf16.mxu0 %v1388_v1 }
  0x11   : > { %v257_v5 = vld [vmem:[%s246_s8 + $0x20] sm:$0xff]  ;;  %v254_v7 = vld [vmem:[%s246_s8 + $0x8] sm:$0xff]  ;;  %v255_v9 = vld [vmem:[%s246_s8 + $0x10] sm:$0xff]  ;;  %s251_s18 = scalar_lea.vmem %s1685_s6, %s1327_s15 }
  0x12   : > { %v253_v6 = vld [vmem:[%s246_s8] sm:$0xff]  ;;  %v1460_v8 = vpack.c.bf16 %v257_v5, %v257_v5  ;;  %v256_v10 = vld [vmem:[%s246_s8 + $0x18] sm:$0xff]  ;;  %v579_v5 = vadd.s32 16, %v1569_v3 }
  0x13   : > { %v258_v11 = vpack.c.bf16 %v254_v7, %v253_v6  ;;  %v259_v12 = vpack.c.bf16 %v256_v10, %v255_v9  ;;  %v1573_v6 = vmul.u32.u64.low 3435973837, %v578_v4  ;;  %v1574_v7 = vmul.u32.u64.high 3435973837, %v578_v4, %v1573_v6 }
  0x14   : > { %v289_v13 = vshll.u32 %v1460_v8, 16  ;;  %v293_v14 = vshrl.u32 %v1460_v8, 16  ;;  %v474_v38 = vrot.slane %v1460_v8, 1 }
  0x15   : > { %v274_v15 = vshrl.u32 %v258_v11, 16  ;;  %v276_v16 = vshll.u32 %v258_v11, 16  ;;  %v281_v17 = vshll.u32 %v259_v12, 16  ;;  %v285_v25 = vshrl.u32 %v259_v12, 16 }
  0x16   : > { %v291_v18 = vrot.slane %v289_v13, 1  ;;  %v471_v35 = vrot.slane %v258_v11, 1  ;;  %v472_v36 = vrot.slane %v259_v12, 1  ;;  %v581_v13 = vadd.s32 32, %v1569_v3 }
  0x17   : > { %v278_v19 = vrot.slane %v276_v16, 1  ;;  %v283_v21 = vrot.slane %v281_v17, 1 }
  0x18   : > { %v295_v22 = vor.u32 %v293_v14, %v291_v18  ;;  %v473_v37 = vsel %vm470_vm4, %v471_v35, %v472_v36  ;;  %v475_v39 = vsel %vm470_vm4, %v472_v36, %v474_v38 }
  0x19   : > { %v279_v23 = vor.u32 %v278_v19, %v274_v15  ;;  %v287_v30 = vor.u32 %v285_v25, %v283_v21 }
  0x1a   : > { %1163 = vmatmul.mubr.msk.bf16.vlgmr.msra.gmra.mrb[0].mxu1 %vm311_vm2, %v295_v22 }
  0x1b   : > { %v284_v26 = vsel %vm272_vm3, %v279_v23, %v283_v21  ;;  %1167 = vmatpush3.bf16.msra.mxu1 %v1352_v20  ;;  %1172 = vmatprep.mubr.msk.bf16.mxu1 %vm1389_vm1, %v1388_v1  ;;  %v292_v33 = vsel %vm272_vm3, %v287_v30, %v291_v18  ;;  %v599_v21 = vshrl.u32 %v1574_v7, 3 }
  0x1c   : > { %1155 = vmatmul.mubr.msk.bf16.vlgmr.msra.gmra.mrb[0].mxu0 %vm311_vm2, %v284_v26  ;;  %1168 = vmatprep.subr.bf16.mxu1 %v1388_v1  ;;  %v1592_v25 = vmul.u32.u64.low 3435973837, %v581_v13  ;;  %v1593_v26 = vmul.u32.u64.high 3435973837, %v581_v13, %v1592_v25 }
  0x1d   : > { %1185 = vmatpush3.bf16.msra.mxu0 %v1353_v24  ;;  %1158 = vmatprep.mubr.msk.bf16.mxu0 %vm1389_vm1, %v1388_v1  ;;  %v600_v29 = vmul.u32 10, %v599_v21 }
  0x1e   : > { %1186 = vmatprep.subr.bf16.mxu0 %v1388_v1 }
  0x1f   : > { %1169 = vmatpush3.bf16.msra.mxu1 %v1354_v27  ;;  %v601_v35 = vsub.s32 %v578_v4, %v600_v29 }
  0x20   : > { %1170 = vmatprep.subr.bf16.mxu1 %v1388_v1 }
  0x21   : > { %1187 = vmatpush3.bf16.msra.mxu0 %v1355_v28  ;;  %vm638_vm5 = vcmp.ne.s32.totalorder %v601_v35, 0  ;;  %vm643_vm6 = vcmp.lt.s32.totalorder %v601_v35, 0 }
  0x22   : > { %1188 = vmatprep.subr.bf16.mxu0 %v1388_v1  ;;  %vm1599_vm11 = vmand %vm643_vm6, %vm638_vm5 }
  0x23   : > { %1171 = vmatpush3.bf16.msra.mxu1 %v403_v32 }
  0x24   : > { %1159 = vmatmul.mubr.msk.bf16.gmra.mrb[4].mxu0 %vm311_vm2, %v292_v33  ;;  %1272 = vmatprep.subr.bf16.mxu1 %v1390_v43 }
  0x25   : > { %1189 = vmatpush3.bf16.msra.mxu0 %v501_v34  ;;  %1190 = vmatprep.mubr.msk.bf16.mxu0 %vm1389_vm1, %v1388_v1 }
  0x26   : > { %1173 = vmatmul.mubr.msk.bf16.vlgmr.msra.gmra.mrb[4].mxu1 %vm311_vm2, %v258_v11  ;;  %1296 = vmatprep.subr.bf16.mxu0 %v1390_v43  ;;  %v1580_v10 = vmul.u32.u64.low 3435973837, %v579_v5  ;;  %v1581_v11 = vmul.u32.u64.high 3435973837, %v579_v5, %v1580_v10 }
  0x27   : > { %1176 = vmatprep.mubr.msk.bf16.mxu1 %vm1389_vm1, %v1388_v1  ;;  %1274 = vmatpush3.bf16.msra.mxu1 %v1273_v42 }
  0x28   : > { %1275 = vmatprep.subr.bf16.mxu1 %v1390_v43  ;;  %v610_v28 = vshrl.u32 %v1581_v11, 3 }
  0x2a   : > { %v611_v31 = vmul.u32 10, %v610_v28 }
  0x2b   : > { %1277 = vmatpush3.bf16.msra.mxu1 %v1276_v46 }
  0x2c   : > { %1191 = vmatmul.mubr.msk.bf16.vlgmr.msra.gmra.mrb[8].mxu0 %vm311_vm2, %v473_v37  ;;  %1278 = vmatprep.subr.bf16.mxu1 %v1390_v43  ;;  %v612_v41 = vsub.s32 %v579_v5, %v611_v31 }
  0x2d   : > { %1194 = vmatprep.mubr.msk.bf16.mxu0 %vm1389_vm1, %v1388_v1  ;;  %1298 = vmatpush3.bf16.msra.mxu0 %v1273_v42 }
  0x2e   : > { %1177 = vmatmul.mubr.msk.bf16.gmra.mrb[8].mxu1 %vm311_vm2, %v259_v12  ;;  %1299 = vmatprep.subr.bf16.mxu0 %v1390_v43  ;;  %v580_v12 = vadd.s32 24, %v1569_v3  ;;  %vm639_vm9 = vcmp.ne.s32.totalorder %v612_v41, 0  ;;  %vm644_vm10 = vcmp.lt.s32.totalorder %v612_v41, 0  ;;  %v654_v57 = vadd.s32 10, %v612_v41 }
  0x2f   : > { %1180 = vmatprep.mubr.msk.bf16.mxu1 %vm1389_vm1, %v1388_v1  ;;  %1280 = vmatpush3.bf16.msra.mxu1 %v1279_v49  ;;  %vm1607_vm13 = vmand %vm644_vm10, %vm639_vm9  ;;  %vm685_vm9 = vcmask 1045504  }
  0x30   : > { %1281 = vmatprep.subr.bf16.mxu1 %v1390_v43  ;;  %v1587_v15 = vmul.u32.u64.low 3435973837, %v580_v12  ;;  %v1588_v16 = vmul.u32.u64.high 3435973837, %v580_v12, %v1587_v15  ;;  %v659_v7 = vsel %vm1607_vm13, %v654_v57, %v612_v41 }
  0x31   : > { %1301 = vmatpush3.bf16.msra.mxu0 %v1276_v46  ;;  %vm664_vm5 = vcmp.lt.s32.totalorder %v659_v7, 8 }
  0x32   : > { %1302 = vmatprep.subr.bf16.mxu0 %v1390_v43  ;;  %v621_v32 = vshrl.u32 %v1588_v16, 3 }
  0x33   : > { %1283 = vmatpush3.bf16.msra.mxu1 %v1282_v52 }
  0x34   : > { %1195 = vmatmul.mubr.msk.bf16.gmra.mrb[12].mxu0 %vm311_vm2, %v475_v39  ;;  %1284 = vmatprep.subr.bf16.mxu1 %v1390_v43  ;;  %v622_v42 = vmul.u32 10, %v621_v32 }
  0x35   : > { %1198 = vmatprep.mubr.msk.bf16.mxu0 %vm1389_vm1, %v1388_v1  ;;  %1304 = vmatpush3.bf16.msra.mxu0 %v1279_v49  ;;  %v653_v49 = vadd.s32 10, %v601_v35 }
  0x36   : > { %1181 = vmatmul.mubr.msk.bf16.gmra.mrb[12].mxu1 %vm311_vm2, %v1460_v8  ;;  %1305 = vmatprep.subr.bf16.mxu0 %v1390_v43  ;;  %v1577_v8 = vmul.u32.u64.low 3435973837, %v1569_v3  ;;  %v1578_v9 = vmul.u32.u64.high 3435973837, %v1569_v3, %v1577_v8  ;;  %v623_v50 = vsub.s32 %v580_v12, %v622_v42  ;;  %v1062_v12 = vld [vmem:[%s1681_s2] ss:$0 sm:$0xff] }
  0x37   : > { %1234 = vmatprep.mubr.msk.f32.mxu1 %vm1389_vm1, %v1388_v1  ;;  %1286 = vmatpush3.bf16.msra.mxu1 %v1285_v55  ;;  %v658_v63 = vsel %vm1599_vm11, %v653_v49, %v601_v35 }
  0x38   : > { %1287 = vmatprep.subr.bf16.mxu1 %v1390_v43  ;;  %v588_v24 = vshrl.u32 %v1578_v9, 3  ;;  %vm640_vm14 = vcmp.ne.s32.totalorder %v623_v50, 0  ;;  %vm645_vm15 = vcmp.lt.s32.totalorder %v623_v50, 0  ;;  %v655_v8 = vadd.s32 10, %v623_v50 }
  0x39   : > { %1307 = vmatpush3.bf16.msra.mxu0 %v1282_v52  ;;  %vm663_vm0 = vcmp.lt.s32.totalorder %v658_v63, 8 }
  0x3a   : > { %1308 = vmatprep.subr.bf16.mxu0 %v1390_v43  ;;  %v589_v30 = vmul.u32 10, %v588_v24 }
  0x3b   : > { %1289 = vmatpush3.bf16.msra.mxu1 %v1288_v58 }
  0x3c   : > { %1199 = vmatmul.mubr.msk.bf16.gmra.mrb[16].mxu0 %vm311_vm2, %v474_v38  ;;  %1290 = vmatprep.subr.bf16.mxu1 %v1390_v43  ;;  %v590_v37 = vsub.s32 %v1569_v3, %v589_v30  ;;  %v632_v38 = vshrl.u32 %v1593_v26, 3  ;;  %v1065_v26 = vsel %vm664_vm5, 1.0, %v1388_v1 }
  0x3d   : > { %1269 = vmatprep.mubr.msk.f32.mxu0 %vm1389_vm1, %v1388_v1  ;;  %1310 = vmatpush3.bf16.msra.mxu0 %v1285_v55  ;;  %vm1617_vm1 = vmand %vm645_vm15, %vm640_vm14 }
  0x3e   : > { %1311 = vmatprep.subr.bf16.mxu0 %v1390_v43  ;;  %vm637_vm7 = vcmp.ne.s32.totalorder %v590_v37, 0  ;;  %vm642_vm8 = vcmp.lt.s32.totalorder %v590_v37, 0  ;;  %v633_v48 = vmul.u32 10, %v632_v38  ;;  %v652_v55 = vadd.s32 10, %v590_v37 }
  0x3f   : > { %1292 = vmatpush3.bf16.msra.mxu1 %v1291_v61  ;;  %vm1603_vm12 = vmand %vm642_vm8, %vm637_vm7 }
  0x40   : > { %1293 = vmatprep.subr.bf16.mxu1 %v1390_v43  ;;  %v634_v60 = vsub.s32 %v581_v13, %v633_v48  ;;  %v657_v5 = vsel %vm1603_vm12, %v652_v55, %v590_v37 }
  0x41   : > { %1313 = vmatpush3.bf16.msra.mxu0 %v1288_v58  ;;  %vm662_vm4 = vcmp.lt.s32.totalorder %v657_v5, 8 }
  0x42   : > { %1314 = vmatprep.subr.bf16.mxu0 %v1390_v43  ;;  %vm641_vm2 = vcmp.ne.s32.totalorder %v634_v60, 0  ;;  %vm646_vm3 = vcmp.lt.s32.totalorder %v634_v60, 0  ;;  %v656_v16 = vadd.s32 10, %v634_v60  ;;  %v1063_v24 = vsel %vm662_vm4, 1.0, %v1388_v1 }
  0x43   : > { %1295 = vmatpush3.bf16.msra.mxu1 %v1294_v0  ;;  %vm1629_vm6 = vmand %vm646_vm3, %vm641_vm2 }
  0x45   : > { %1316 = vmatpush3.bf16.msra.mxu0 %v1291_v61 }
  0x46   : > { %1317 = vmatprep.subr.bf16.mxu0 %v1390_v43 }
  0x49   : > { %1319 = vmatpush3.bf16.msra.mxu0 %v1294_v0 }
  0xed   : > { %v1585_v14 = vpop.f32.mrb[0].mxu1 }
  0xee   : > { %v1164_v18 = vpop.f32.mrb[1].mxu1 }
  0xef   : > { %v359_v17 = vpop.f32.mrb[0].mxu0  ;;  %v378_v20 = vpop.f32.mrb[2].mxu1 }
  0xf0   : > { %v1156_v19 = vpop.f32.mrb[1].mxu0  ;;  %v1165_v23 = vpop.f32.mrb[3].mxu1  ;;  %v660_v20 = vsel %vm1617_vm1, %v655_v8, %v623_v50 }
  0xf1   : > { %v362_v22 = vpop.f32.mrb[2].mxu0  ;;  %vm665_vm7 = vcmp.lt.s32.totalorder %v660_v20, 8 }
  0xf2   : > { %v1157_v27 = vpop.f32.mrb[3].mxu0 }
  0xf7   : > { %v367_v33 = vpop.f32.mrb[4].mxu0 }
  0xf8   : > { %v1160_v34 = vpop.f32.mrb[5].mxu0 }
  0xf9   : > { %v370_v36 = vpop.f32.mrb[6].mxu0  ;;  %v439_v39 = vpop.f32.mrb[4].mxu1 }
  0xfa   : > { %v1161_v40 = vpop.f32.mrb[7].mxu0  ;;  %v440_v43 = vadd.f32 %v439_v39, %v359_v17  ;;  %v1174_v44 = vpop.f32.mrb[5].mxu1  ;;  %v1064_v17 = vsel %vm663_vm0, 1.0, %v1388_v1  ;;  %v1066_v39 = vsel %vm665_vm7, 1.0, %v1388_v1 }
  0xfb   : > { %v442_v45 = vpop.f32.mrb[6].mxu1 }
  0xfc   : > { %v443_v46 = vadd.f32 %v442_v45, %v362_v22  ;;  %v1175_v47 = vpop.f32.mrb[7].mxu1 }
  0xff   : > { %v537_v51 = vpop.f32.mrb[8].mxu0 }
 0x100   : > { %v559_v53 = vadd.f32 %v537_v51, %v440_v43  ;;  %v1192_v56 = vpop.f32.mrb[9].mxu0 }
 0x101   : > { %v540_v58 = vpop.f32.mrb[10].mxu0  ;;  %v447_v61 = vpop.f32.mrb[8].mxu1 }
 0x102   : > { %v560_v62 = vadd.f32 %v540_v58, %v443_v46  ;;  %v1193_v0 = vpop.f32.mrb[11].mxu0  ;;  %v448_v2 = vadd.f32 %v447_v61, %v367_v33  ;;  %v1178_v4 = vpop.f32.mrb[9].mxu1  ;;  %v1633_v22 = vadd.f32 %v1062_v12, %v559_v53  ;;  %v661_v33 = vsel %vm1629_vm6, %v656_v16, %v634_v60 }
 0x103   : > { %v450_v6 = vpop.f32.mrb[10].mxu1  ;;  %vm666_vm8 = vcmp.lt.s32.totalorder %v661_v33, 8 }
 0x104   : > { %v451_v9 = vadd.f32 %v450_v6, %v370_v36  ;;  %v1179_v10 = vpop.f32.mrb[11].mxu1  ;;  %v1624_v13 = vadd.f32 %v1062_v12, %v560_v62  ;;  %v677_v35 = vmul.f32 %v1063_v24, %v1633_v22  ;;  %v1067_v45 = vsel %vm666_vm8, 1.0, %v1388_v1 }
 0x105   : > { %v783_v1 = vsub.s32 0, %v1569_v3 }
 0x106   : > { %v678_v30 = vmul.f32 %v1064_v17, %v1624_v13 }
 0x107   : > { %v545_v15 = vpop.f32.mrb[12].mxu0 }
 0x108   : > { %v561_v18 = vadd.f32 %v545_v15, %v448_v2  ;;  %v1196_v19 = vpop.f32.mrb[13].mxu0  ;;  %v682_v40 = vadd.f32 %v678_v30, %v677_v35 }
 0x109   : > { %v548_v23 = vpop.f32.mrb[14].mxu0  ;;  %v455_v27 = vpop.f32.mrb[12].mxu1 }
 0x10a   : > { %v1636_v25 = vadd.f32 %v1062_v12, %v561_v18  ;;  %v562_v28 = vadd.f32 %v548_v23, %v451_v9  ;;  %v1197_v29 = vpop.f32.mrb[15].mxu0  ;;  %v456_v31 = vadd.f32 %v455_v27, %v1585_v14  ;;  %v1182_v32 = vpop.f32.mrb[13].mxu1 }
 0x10b   : > { %v458_v34 = vpop.f32.mrb[14].mxu1 }
 0x10c   : > { %v679_v36 = vmul.f32 %v1065_v26, %v1636_v25  ;;  %v1645_v37 = vadd.f32 %v1062_v12, %v562_v28  ;;  %v1183_v38 = vpop.f32.mrb[15].mxu1  ;;  %v882_v34 = vld [vmem:[%s1682_s3] sm:$0x1] }
 0x10d   : > { %v886_v38 = vld [vmem:[%s1683_s4] sm:$0x1] }
 0x10e   : > { %v683_v43 = vadd.f32 %v682_v40, %v679_v36  ;;  %v680_v44 = vmul.f32 %v1066_v39, %v1645_v37 }
 0x10f   : > { %v553_v41 = vpop.f32.mrb[16].mxu0 }
 0x110   : > { %v563_v42 = vadd.f32 %v553_v41, %v456_v31  ;;  %v1200_v14 = vpop.f32.mrb[17].mxu0  ;;  %v684_v50 = vadd.f32 %v683_v43, %v680_v44 }
 0x111   : > { %v556_v46 = vpop.f32.mrb[18].mxu0 }
 0x112   : > { %v1650_v47 = vadd.f32 %v1062_v12, %v563_v42  ;;  %v1201_v48 = vpop.f32.mrb[19].mxu0 }
 0x114   : > { %v681_v49 = vmul.f32 %v1067_v45, %v1650_v47 }
 0x116   : > { %v686_v51 = vsel %vm685_vm9, %v681_v49, 0.0 }
 0x117   : > { %v687_v52 = vadd.f32 %v686_v51, %v684_v50 }
 0x119   : > { %v688_v53 = vrot.slane %v687_v52, 4 }
 0x11b   : > { %v689_v54 = vadd.f32 %v688_v53, %v687_v52 }
 0x11d   : > { %v690_v55 = vrot.slane %v689_v54, 2 }
 0x11f   : > { %v691_v56 = vadd.f32 %v690_v55, %v689_v54 }
 0x121   : > { %v692_v57 = vrot.slane %v691_v56, 1 }
 0x123   : > { %v693_v58 = vadd.f32 %v692_v57, %v691_v56 }
 0x125   : > { %1235 = vmatmul.mubr.f32.vlgmr.msra.gmra.mrb[16].mxu1 %v693_v58 }
 0x1f8   : > { %v776_v59 = vpop.f32.mrb[16].mxu1 }
 0x1f9   : > { %v780_v60 = vmul.f32 0.001953125, %v776_v59  ;;  %v1236_v61 = vpop.f32.mrb[17].mxu1 }
 0x1fb   : > { %v784_v62 = vrot.slane %v780_v60, %v783_v1 }
 0x1fd   : > { %v785_v63 = vsub.f32 %v1633_v22, %v784_v62  ;;  %v786_v0 = vsub.f32 %v1624_v13, %v784_v62  ;;  %v787_v2 = vsub.f32 %v1636_v25, %v784_v62  ;;  %v788_v4 = vsub.f32 %v1645_v37, %v784_v62 }
 0x1fe   : > { %v789_v5 = vsub.f32 %v1650_v47, %v784_v62 }
 0x1ff   : > { %v790_v6 = vmul.f32 %v1063_v24, %v785_v63  ;;  %v791_v7 = vmul.f32 %v1064_v17, %v786_v0  ;;  %v792_v8 = vmul.f32 %v1065_v26, %v787_v2  ;;  %v793_v10 = vmul.f32 %v1066_v39, %v788_v4 }
 0x200   : > { %v794_v9 = vmul.f32 %v1067_v45, %v789_v5 }
 0x201   : > { %v795_v3 = vmul.f32 %v790_v6, %v790_v6  ;;  %v796_v11 = vmul.f32 %v791_v7, %v791_v7  ;;  %v797_v12 = vmul.f32 %v792_v8, %v792_v8  ;;  %v798_v18 = vmul.f32 %v793_v10, %v793_v10 }
 0x202   : > { %v799_v16 = vmul.f32 %v794_v9, %v794_v9 }
 0x203   : > { %v800_v15 = vadd.f32 %v796_v11, %v795_v3 }
 0x204   : > { %v803_v21 = vsel %vm685_vm9, %v799_v16, 0.0 }
 0x205   : > { %v801_v19 = vadd.f32 %v800_v15, %v797_v12 }
 0x207   : > { %v802_v20 = vadd.f32 %v801_v19, %v798_v18 }
 0x209   : > { %v804_v23 = vadd.f32 %v803_v21, %v802_v20 }
 0x20b   : > { %v805_v27 = vrot.slane %v804_v23, 4 }
 0x20d   : > { %v806_v28 = vadd.f32 %v805_v27, %v804_v23 }
 0x20f   : > { %v807_v29 = vrot.slane %v806_v28, 2 }
 0x211   : > { %v808_v30 = vadd.f32 %v807_v29, %v806_v28 }
 0x213   : > { %v809_v24 = vrot.slane %v808_v30, 1 }
 0x215   : > { %v810_v17 = vadd.f32 %v809_v24, %v808_v30 }
 0x217   : > { %1270 = vmatmul.mubr.f32.vlgmr.msra.gmra.mrb[20].mxu0 %v810_v17 }
 0x2ea   : > { %v877_v26 = vpop.f32.mrb[20].mxu0 }
 0x2eb   : > { %v881_v31 = vmul.f32 0.001953125, %v877_v26  ;;  %v1271_v32 = vpop.f32.mrb[21].mxu0 }
 0x2ed   : > { %v883_v33 = vadd.f32 1e-05, %v881_v31 }
 0x2ef   : > { %1358 = vrsqrt.f32 %v883_v33 }
 0x2f9   : > { %v1359_v35 = vpop.eup %1358 }
 0x2fa   : > { %v885_v36 = vmul.f32 %v1359_v35, %v882_v34 }
 0x2fc   : > { %v887_v39 = vmul.f32 %v885_v36, %v780_v60  ;;  %v893_v40 = vrot.slane %v885_v36, %v783_v1 }
 0x2fe   : > { %v888_v41 = vsub.f32 %v886_v38, %v887_v39  ;;  %v895_v42 = vmul.f32 %v893_v40, %v1633_v22  ;;  %v896_v14 = vmul.f32 %v893_v40, %v1624_v13  ;;  %v897_v43 = vmul.f32 %v893_v40, %v1636_v25 }
 0x2ff   : > { %v898_v44 = vmul.f32 %v893_v40, %v1645_v37  ;;  %v899_v46 = vmul.f32 %v893_v40, %v1650_v47 }
 0x300   : > { %v904_v45 = vrot.slane %v888_v41, %v783_v1 }
 0x302   : > { %v906_v48 = vadd.f32 %v904_v45, %v895_v42  ;;  %v907_v49 = vadd.f32 %v904_v45, %v896_v14  ;;  %v908_v50 = vadd.f32 %v904_v45, %v897_v43  ;;  %v909_v51 = vadd.f32 %v904_v45, %v898_v44 }
 0x303   : > { %v910_v52 = vadd.f32 %v904_v45, %v899_v46 }
 0x304   : > { %v1068_v53 = vmul.f32 -1.442695, %v906_v48  ;;  %v1069_v54 = vmul.f32 -1.442695, %v907_v49  ;;  %v1070_v55 = vmul.f32 -1.442695, %v908_v50 }
 0x305   : > { %v1071_v56 = vmul.f32 -1.442695, %v909_v51  ;;  %v1072_v22 = vmul.f32 -1.442695, %v910_v52 }
 0x306   : > { %1360 = vpow2.f32 %v1068_v53 }
 0x307   : > { %1362 = vpow2.f32 %v1069_v54 }
 0x308   : > { %1364 = vpow2.f32 %v1070_v55 }
 0x309   : > { %1366 = vpow2.f32 %v1071_v56 }
 0x30a   : > { %1368 = vpow2.f32 %v1072_v22 }
 0x310   : > { %v1361_v13 = vpop.eup %1360 }
 0x311   : > { %v1363_v25 = vpop.eup %1362  ;;  %v926_v37 = vadd.f32 1.0, %v1361_v13 }
 0x312   : > { %v1365_v47 = vpop.eup %1364  ;;  %v927_v57 = vadd.f32 1.0, %v1363_v25 }
 0x313   : > { %v1367_v58 = vpop.eup %1366  ;;  %v928_v1 = vadd.f32 1.0, %v1365_v47  ;;  %1370 = vrcp.f32 %v926_v37 }
 0x314   : > { %v1369_v59 = vpop.eup %1368  ;;  %v929_v60 = vadd.f32 1.0, %v1367_v58  ;;  %1372 = vrcp.f32 %v927_v57 }
 0x315   : > { %v930_v61 = vadd.f32 1.0, %v1369_v59  ;;  %1374 = vrcp.f32 %v928_v1 }
 0x316   : > { %1376 = vrcp.f32 %v929_v60 }
 0x317   : > { %1378 = vrcp.f32 %v930_v61 }
 0x31d   : > { %v1371_v62 = vpop.eup %1370 }
 0x31e   : > { %v1373_v63 = vpop.eup %1372  ;;  %v941_v0 = vmul.f32 %v1371_v62, %v906_v48 }
 0x31f   : > { %v1375_v2 = vpop.eup %1374  ;;  %v942_v4 = vmul.f32 %v1373_v63, %v907_v49 }
 0x320   : > { %v1377_v5 = vpop.eup %1376  ;;  %v943_v6 = vmul.f32 %v1375_v2, %v908_v50 }
 0x321   : > { %v1379_v7 = vpop.eup %1378  ;;  %v944_v8 = vmul.f32 %v1377_v5, %v909_v51  ;;  %v1088_v9 = vpack.c.bf16 %v942_v4, %v941_v0 }
 0x322   : > { %v945_v10 = vmul.f32 %v1379_v7, %v910_v52 }
 0x323   : > { %1089 = vst [vmem:[%s251_s18] sm:$0xff] %v1088_v9   ;;  %v1093_v3 = vpack.c.bf16 %v944_v8, %v943_v6 }
 0x324   : > { %v1084_v11 = vpack.c.bf16 %v945_v10, %v945_v10 }
 0x325   : > { %1095 = vst [vmem:[%s251_s18 + $0x8] sm:$0xff] %v1093_v3  }
 0x326   : > { %971 = vst [vmem:[%s251_s18 + $0x10] sm:$0x7] %v1084_v11 }
 0x327 PF: > { %s16_s21 = sadd.s32 1, %s1386_s21  }
 0x328   : > { %p13_p4 = scmp.ge.s32.totalorder %s16_s21, 4  }
 0x32a   :  { %15 = sbr.rel (!%p13_p4) target bundleno = 1 (0x1), region = 76 }

// kernel: temporal_aware_spatial_block.3
= control target key start
LH: loop header
LB: loop body
LE: loop exit
PB: predicated region body
PF: predicated region fallthrough
CT: control target
= control target key end

     0   :  { %s2990_s21 = smov 0   ;;  %s3891_s0 = inlined_call_operand.vmem [shape: bf16[2,60,160], index: 0, kind: input, shape index: {}]   ;;  %s3892_s1 = inlined_call_operand.vmem [shape: bf16[3,3,160,128], index: 1, kind: input, shape index: {}]   ;;  %s3893_s2 = inlined_call_operand.vmem [shape: f32[1,128], index: 2, kind: input, shape index: {}]   ;;  %s3894_s3 = inlined_call_operand.vmem [shape: f32[1,128], index: 3, kind: input, shape index: {}]   ;;  %s3895_s4 = inlined_call_operand.vmem [shape: f32[1,128], index: 4, kind: input, shape index: {}]   ;;  %s3896_s5 = inlined_call_operand.vmem [shape: f32[128,128], index: 5, kind: input, shape index: {}]   ;;  %s3897_s6 = inlined_call_operand.vmem [shape: f32[2,38,128], index: 6, kind: output, shape index: {}]  }
   0x1 LB: > { %s2321_s22 = sadd.s32 4294967295, %s2949_s21   ;;  %p2325_p0 = scmp.ge.s32.totalorder %s2949_s21, 1  ;;  %s2949_s21 = sphi %s2990_s21, %s16_s21  }
   0x2   : > { %p212_p1 = scmp.lt.s32.totalorder %s2949_s21, 3 }
   0x4   : > { %p213_p2 = pnand %p2325_p0, %p212_p1 }
   0x5   : > { %v2813_v0 = vld [vmem:[%s3892_s1 + $0x50] sm:$0xff] (!%p213_p2)   ;;  %v2951_v1 = vmov (!%p213_p2), 0   ;;  %v2814_v2 = vld [vmem:[%s3892_s1] sm:$0xff] (!%p213_p2)   ;;  %v2815_v3 = vld [vmem:[%s3892_s1 + $0x58] sm:$0xff] (!%p213_p2)   ;;  %p242_p3 = scmp.lt.s32.totalorder (!%p213_p2), %s2321_s22, 1  ;;  %vm434_vm0 = vcmask (!%p213_p2), 261120  }
   0x6   : > { %216 = sbr.rel (%p213_p2) target bundleno = 967 (0x3c7), region = 44  ;;  %444 = vmatprep.subr.bf16.mxu0 (!%p213_p2), %v2951_v1  ;;  %566 = vmatprep.subr.bf16.mxu1 (!%p213_p2), %v2951_v1  ;;  %v2816_v4 = vld [vmem:[%s3892_s1 + $0x8] sm:$0xff] (!%p213_p2)   ;;  %v2817_v5 = vld [vmem:[%s3892_s1 + $0x60] sm:$0xff] (!%p213_p2)   ;;  %v2818_v6 = vld [vmem:[%s3892_s1 + $0x10] sm:$0xff] (!%p213_p2)   ;;  %vm324_vm1 = vsmask.f32 (!%p213_p2), 7424 }
   0x7   : > { %445 = vmatpush1.bf16.msra.mxu0 (!%p213_p2), %v2813_v0  ;;  %567 = vmatpush1.bf16.msra.mxu1 (!%p213_p2), %v2814_v2  ;;  %v2819_v7 = vld [vmem:[%s3892_s1 + $0x68] sm:$0xff] (!%p213_p2)   ;;  %v2820_v8 = vld [vmem:[%s3892_s1 + $0x18] sm:$0xff] (!%p213_p2)   ;;  %v2821_v9 = vld [vmem:[%s3892_s1 + $0x70] sm:$0xff] (!%p213_p2)   ;;  %vm649_vm2 = vcmask (!%p213_p2), 1046528   ;;  %vm1201_vm3 = vcmask (!%p213_p2), 1045504   ;;  %vm1735_vm4 = vcmask (!%p213_p2), 1044480  }
   0x8   : > { %446 = vmatprep.subr.bf16.mxu0 (!%p213_p2), %v2951_v1  ;;  %568 = vmatprep.subr.bf16.mxu1 (!%p213_p2), %v2951_v1  ;;  %v2822_v10 = vld [vmem:[%s3892_s1 + $0x20] sm:$0xff] (!%p213_p2)   ;;  %v2823_v11 = vld [vmem:[%s3892_s1 + $0x78] sm:$0xff] (!%p213_p2)   ;;  %v2824_v12 = vld [vmem:[%s3892_s1 + $0x28] sm:$0xff] (!%p213_p2)   ;;  %vm1538_vm5 = vsmask.f32 (!%p213_p2), 5376  ;;  %vm2953_vm7 = vmmov (!%p213_p2), 0  }
   0x9   : > { %v2825_v18 = vld [vmem:[%s3892_s1 + $0x80] sm:$0xff] (!%p213_p2)   ;;  %v2826_v21 = vld [vmem:[%s3892_s1 + $0x30] sm:$0xff] (!%p213_p2)   ;;  %v2827_v25 = vld [vmem:[%s3892_s1 + $0x88] sm:$0xff] (!%p213_p2)   ;;  %vm992_vm6 = vsmask.f32 (!%p213_p2), 6400 }
   0xa   : > { %v2828_v27 = vld [vmem:[%s3892_s1 + $0x38] sm:$0xff] (!%p213_p2)   ;;  %v2829_v34 = vld [vmem:[%s3892_s1 + $0x90] sm:$0xff] (!%p213_p2)   ;;  %v2830_v40 = vld [vmem:[%s3892_s1 + $0x40] sm:$0xff] (!%p213_p2)  }
   0xb   : > { %447 = vmatpush1.bf16.msra.mxu0 (!%p213_p2), %v2815_v3  ;;  %569 = vmatpush1.bf16.msra.mxu1 (!%p213_p2), %v2816_v4  ;;  %v2831_v44 = vld [vmem:[%s3892_s1 + $0x98] sm:$0xff] (!%p213_p2)   ;;  %v2832_v49 = vld [vmem:[%s3892_s1 + $0x48] sm:$0xff] (!%p213_p2)   ;;  %v2837_v53 = vld [vmem:[%s3892_s1 + $0xa0] sm:$0xff] (!%p213_p2)  }
   0xc   : > { %448 = vmatprep.subr.bf16.mxu0 (!%p213_p2), %v2951_v1  ;;  %570 = vmatprep.subr.bf16.mxu1 (!%p213_p2), %v2951_v1  ;;  %v2838_v54 = vld [vmem:[%s3892_s1 + $0xf0] sm:$0xff] (!%p213_p2)   ;;  %v2839_v58 = vld [vmem:[%s3892_s1 + $0xa8] sm:$0xff] (!%p213_p2)   ;;  %v2840_v61 = vld [vmem:[%s3892_s1 + $0xf8] sm:$0xff] (!%p213_p2)  }
   0xd   : > { %s3907_s22 = smov (!%p242_p3, %s2321_s22), 1  ;;  %v2841_v63 = vld [vmem:[%s3892_s1 + $0xb0] sm:$0xff]   ;;  %v2842_v2 = vld [vmem:[%s3892_s1 + $0x100] sm:$0xff]  }
   0xe   : > { %s2637_s17 = sshll.u32 %s3907_s22, 6  ;;  %s2790_s30 = smul.u32 40, %s3907_s22 }
   0xf   : > { %449 = vmatpush1.bf16.msra.mxu0 %v2817_v5  ;;  %571 = vmatpush1.bf16.msra.mxu1 %v2818_v6  ;;  %s3044_s24 = scalar_lea.vmem %s3891_s0, %s2637_s17 }
  0x10   : > { %450 = vmatprep.subr.bf16.mxu0 %v2951_v1  ;;  %572 = vmatprep.subr.bf16.mxu1 %v2951_v1  ;;  %v253_v13 = vld [vmem:[%s3044_s24] sm:$0xff]  ;;  %v3056_v14 = vld [vmem:[%s3044_s24 + $0x8] sm:$0xff]  ;;  %v3059_v15 = vld [vmem:[%s3044_s24 + $0x10] sm:$0xff]  ;;  %s251_s9 = scalar_lea.vmem %s3897_s6, %s2790_s30 }
  0x11   : > { %v3062_v16 = vld [vmem:[%s3044_s24 + $0x18] sm:$0xff]  ;;  %v3065_v17 = vcombine.high %v253_v13, %v3056_v14  ;;  %v3075_v20 = vcombine.low %v253_v13, %v3056_v14  ;;  %v3121_v42 = vld [vmem:[%s3044_s24 + $0x20] sm:$0xff]  ;;  %v3178_v4 = vld [vmem:[%s3044_s24 + $0x28] sm:$0xff] }
  0x12   : > { %v3072_v19 = vcombine.high %v3059_v15, %v3062_v16  ;;  %v3085_v24 = vcombine.low %v3059_v15, %v3062_v16  ;;  %v3130_v47 = vcombine.high %v3121_v42, %v3121_v42  ;;  %v3134_v48 = vcombine.low %v3121_v42, %v3121_v42 }
  0x13   : > { %451 = vmatpush1.bf16.msra.mxu0 %v2819_v7  ;;  %573 = vmatpush1.bf16.msra.mxu1 %v2820_v8  ;;  %v338_v22 = vshrl.u32 %v3065_v17, 16  ;;  %v340_v23 = vshll.u32 %v3065_v17, 16  ;;  %v328_v30 = vshll.u32 %v3075_v20, 16  ;;  %v326_v38 = vshrl.u32 %v3075_v20, 16  ;;  %v2843_v7 = vld [vmem:[%s3892_s1 + $0xb8] sm:$0xff]  }
  0x14   : > { %452 = vmatprep.subr.bf16.mxu0 %v2951_v1  ;;  %574 = vmatprep.subr.bf16.mxu1 %v2951_v1  ;;  %v345_v26 = vshll.u32 %v3072_v19, 16  ;;  %v333_v32 = vshll.u32 %v3085_v24, 16  ;;  %v349_v33 = vshrl.u32 %v3085_v24, 16  ;;  %v357_v41 = vshrl.u32 %v3072_v19, 16 }
  0x15   : > { %2378 = vmatprep.mubr.msk.bf16.mxu1 %vm434_vm0, %v3065_v17  ;;  %v342_v28 = vrot.slane %v340_v23, 1  ;;  %v330_v39 = vrot.slane %v328_v30, 1  ;;  %v361_v50 = vshll.u32 %v3130_v47, 16  ;;  %v353_v56 = vshll.u32 %v3134_v48, 16  ;;  %v2852_v30 = vld [vmem:[%s3892_s1 + $0x120] sm:$0xff]  }
  0x16   : > { %v347_v29 = vrot.slane %v345_v26, 1  ;;  %v3108_v36 = vrot.slane %v333_v32, 3  ;;  %v3110_v37 = vrot.slane %v349_v33, 2  ;;  %v335_v46 = vrot.slane %v333_v32, 1 }
  0x17   : > { %453 = vmatpush1.bf16.msra.mxu0 %v2821_v9  ;;  %575 = vmatpush1.bf16.msra.mxu1 %v2822_v10  ;;  %v343_v31 = vor.u32 %v342_v28, %v338_v22  ;;  %v331_v45 = vor.u32 %v330_v39, %v326_v38  ;;  %v363_v55 = vrot.slane %v361_v50, 1  ;;  %v355_v60 = vrot.slane %v353_v56, 1  ;;  %v2844_v10 = vld [vmem:[%s3892_s1 + $0x108] sm:$0xff]   ;;  %v2850_v28 = vld [vmem:[%s3892_s1 + $0x118] sm:$0xff]  }
  0x18   : > { %454 = vmatprep.subr.bf16.mxu0 %v2951_v1  ;;  %576 = vmatprep.subr.bf16.mxu1 %v2951_v1  ;;  %v1541_v43 = vor.u32 %v3108_v36, %v3110_v37  ;;  %v359_v51 = vor.u32 %v357_v41, %v347_v29  ;;  %v351_v59 = vor.u32 %v349_v33, %v335_v46  ;;  %v368_v62 = vshrl.u32 %v3130_v47, 16  ;;  %v2854_v33 = vld [vmem:[%s3892_s1 + $0x128] sm:$0xff]   ;;  %v2871_v36 = vld [vmem:[%s3892_s1 + $0x158] sm:$0xff]  }
  0x19   : > { %v348_v35 = vsel %vm324_vm1, %v343_v31, %v347_v29  ;;  %v336_v52 = vsel %vm324_vm1, %v331_v45, %v335_v46  ;;  %v365_v5 = vshrl.u32 %v3134_v48, 16  ;;  %v3183_v6 = vcombine.low %v3121_v42, %v3178_v4  ;;  %v2851_v29 = vld [vmem:[%s3892_s1 + $0xd0] sm:$0xff]   ;;  %v2853_v31 = vld [vmem:[%s3892_s1 + $0xd8] sm:$0xff]   ;;  %v2857_v46 = vld [vmem:[%s3892_s1 + $0xe8] sm:$0xff]  }
  0x1a   : > { %2365 = vmatprep.mubr.msk.bf16.mxu0 %vm434_vm0, %v348_v35  ;;  %v364_v57 = vsel %vm324_vm1, %v359_v51, %v363_v55  ;;  %v356_v0 = vsel %vm324_vm1, %v351_v59, %v355_v60  ;;  %v370_v3 = vor.u32 %v368_v62, %v363_v55  ;;  %v3191_v8 = vcombine.high %v3056_v14, %v3059_v15  ;;  %v2864_v59 = vld [vmem:[%s3892_s1 + $0x190] sm:$0xff]   ;;  %v2872_v37 = vld [vmem:[%s3892_s1 + $0x1a8] sm:$0xff]  }
  0x1b   : > { %455 = vmatpush1.bf16.msra.mxu0 %v2823_v11  ;;  %577 = vmatpush1.bf16.msra.mxu1 %v2824_v12  ;;  %v3195_v9 = vcombine.high %v3062_v16, %v3121_v42  ;;  %v653_v11 = vrot.slane %v3065_v17, 1  ;;  %v2845_v12 = vld [vmem:[%s3892_s1 + $0xc0] sm:$0xff]   ;;  %v367_v13 = vor.u32 %v365_v5, %v355_v60  ;;  %v2846_v17 = vld [vmem:[%s3892_s1 + $0x110] sm:$0xff]   ;;  %v3247_v32 = vcombine.high %v3121_v42, %v3178_v4 }
  0x1c   : > { %456 = vmatprep.subr.bf16.mxu0 %v2951_v1  ;;  %578 = vmatprep.subr.bf16.mxu1 %v2951_v1  ;;  %v3258_v38 = vcombine.low %v3056_v14, %v3059_v15  ;;  %v1374_v39 = vrot.slane %v3085_v24, 2  ;;  %v1375_v45 = vrot.slane %v3183_v6, 2  ;;  %v2855_v14 = vld [vmem:[%s3892_s1 + $0xe0] sm:$0xff]   ;;  %v3276_v15 = vrot.slane %v345_v26, 3 }
  0x1d   : > { %v830_v22 = vrot.slane %v3195_v9, 1  ;;  %v1378_v35 = vrot.slane %v3247_v32, 2  ;;  %v650_v26 = vrot.slane %v3075_v20, 1  ;;  %v1555_v55 = vshrl.u32 %v3247_v32, 16 }
  0x1e   : > { %v826_v50 = vrot.slane %v3258_v38, 1 }
  0x1f   : > { %457 = vmatpush1.bf16.msra.mxu0 %v2825_v18  ;;  %579 = vmatpush1.bf16.msra.mxu1 %v2826_v21  ;;  %v654_v18 = vrot.slane %v3072_v19, 1  ;;  %v829_v21 = vrot.slane %v3191_v8, 1 }
  0x20   : > { %458 = vmatprep.subr.bf16.mxu0 %v2951_v1  ;;  %580 = vmatprep.subr.bf16.mxu1 %v2951_v1 }
  0x21   : > { %v655_v23 = vsel %vm649_vm2, %v653_v11, %v654_v18 }
  0x23   : > { %459 = vmatpush1.bf16.msra.mxu0 %v2827_v25  ;;  %581 = vmatpush1.bf16.msra.mxu1 %v2828_v27  ;;  %v2848_v25 = vld [vmem:[%s3892_s1 + $0xc8] sm:$0xff]   ;;  %v831_v27 = vsel %vm649_vm2, %v829_v21, %v830_v22 }
  0x24   : > { %460 = vmatprep.subr.bf16.mxu0 %v2951_v1  ;;  %582 = vmatprep.subr.bf16.mxu1 %v2951_v1 }
  0x27   : > { %461 = vmatpush1.bf16.msra.mxu0 %v2829_v34  ;;  %583 = vmatpush1.bf16.msra.mxu1 %v2830_v40  ;;  %v1377_v34 = vrot.slane %v3072_v19, 2  ;;  %v3263_v40 = vcombine.low %v3062_v16, %v3121_v42  ;;  %v2856_v16 = vld [vmem:[%s3892_s1 + $0x130] sm:$0xff]   ;;  %v3285_v42 = vsel %vm1201_vm3, %v1374_v39, %v1375_v45 }
  0x28   : > { %462 = vmatprep.subr.bf16.mxu0 %v2951_v1  ;;  %584 = vmatprep.subr.bf16.mxu1 %v2951_v1 }
  0x29   : > { %v827_v51 = vrot.slane %v3263_v40, 1 }
  0x2b   : > { %463 = vmatpush1.bf16.msra.mxu0 %v2831_v44  ;;  %585 = vmatpush1.bf16.msra.mxu1 %v2832_v49  ;;  %v3268_v44 = vsel %vm1201_vm3, %v1377_v34, %v1378_v35  ;;  %v651_v49 = vrot.slane %v3085_v24, 1 }
  0x2c   : > { %732 = vmatprep.subr.bf16.mxu0 %v2951_v1  ;;  %908 = vmatprep.subr.bf16.mxu1 %v2951_v1 }
  0x2d   : > { %v652_v62 = vsel %vm649_vm2, %v650_v26, %v651_v49 }
  0x2e   : > { %477 = vmatmul.mubr.bf16.vlgmr.msra.gmra.mrb[0].mxu0 %v336_v52  ;;  %599 = vmatmul.mubr.bf16.vlgmr.msra.gmra.mrb[0].mxu1 %v3075_v20  ;;  %v2419_v52 = vcombine.high %v3178_v4, %v3178_v4  ;;  %v658_v20 = vrot.slane %v3130_v47, 1 }
  0x2f   : > { %733 = vmatpush1.bf16.msra.mxu0 %v2837_v53  ;;  %909 = vmatpush1.bf16.msra.mxu1 %v2838_v54  ;;  %v1551_v53 = vrot.slane %v357_v41, 2  ;;  %v2858_v54 = vld [vmem:[%s3892_s1 + $0x138] sm:$0xff]   ;;  %v2861_v41 = vld [vmem:[%s3892_s1 + $0x140] sm:$0xff]  }
  0x30   : > { %734 = vmatprep.subr.bf16.mxu0 %v2951_v1  ;;  %910 = vmatprep.subr.bf16.mxu1 %v2951_v1  ;;  %v3315_v60 = vrot.slane %v2419_v52, 1 }
  0x31   : > { %2366 = vmatprep.mubr.msk.bf16.mxu0 %vm434_vm0, %v364_v57  ;;  %2379 = vmatprep.mubr.msk.bf16.mxu1 %vm434_vm0, %v3072_v19  ;;  %v1553_v56 = vor.u32 %v3276_v15, %v1551_v53  ;;  %v1558_v57 = vshll.u32 %v3247_v32, 16  ;;  %v2873_v53 = vld [vmem:[%s3892_s1 + $0x160] sm:$0xff]  }
  0x33   : > { %735 = vmatpush1.bf16.msra.mxu0 %v2839_v58  ;;  %911 = vmatpush1.bf16.msra.mxu1 %v2840_v61  ;;  %v656_v58 = vrot.slane %v3134_v48, 1  ;;  %v1011_v61 = vshrl.u32 %v3191_v8, 16  ;;  %v1560_v5 = vrot.slane %v1558_v57, 3  ;;  %v2877_v57 = vld [vmem:[%s3892_s1 + $0x170] sm:$0xff]  }
  0x34   : > { %736 = vmatprep.subr.bf16.mxu0 %v2951_v1  ;;  %912 = vmatprep.subr.bf16.mxu1 %v2951_v1 }
  0x36   : > { %485 = vmatmul.mubr.bf16.gmra.mrb[4].mxu0 %v356_v0  ;;  %607 = vmatmul.mubr.bf16.gmra.mrb[4].mxu1 %v3085_v24  ;;  %v1557_v0 = vrot.slane %v1555_v55, 2  ;;  %v1206_v55 = vrot.slane %v3195_v9, 2 }
  0x37   : > { %737 = vmatpush1.bf16.msra.mxu0 %v2841_v63  ;;  %913 = vmatpush1.bf16.msra.mxu1 %v2842_v2  ;;  %v2418_v63 = vcombine.low %v3178_v4, %v3178_v4  ;;  %v1543_v2 = vshrl.u32 %v3183_v6, 16 }
  0x38   : > { %738 = vmatprep.subr.bf16.mxu0 %v2951_v1  ;;  %914 = vmatprep.subr.bf16.mxu1 %v2951_v1 }
  0x39   : > { %2367 = vmatprep.mubr.msk.bf16.mxu0 %vm434_vm0, %v370_v3  ;;  %2380 = vmatprep.mubr.msk.bf16.mxu1 %vm434_vm0, %v3130_v47  ;;  %v828_v3 = vsel %vm649_vm2, %v826_v50, %v827_v51  ;;  %v1545_v11 = vrot.slane %v1543_v2, 2  ;;  %v1205_v47 = vrot.slane %v3191_v8, 2  ;;  %v2880_v2 = vld [vmem:[%s3892_s1 + $0x1c8] sm:$0xff]  }
  0x3b   : > { %739 = vmatpush1.bf16.msra.mxu0 %v2843_v7  ;;  %915 = vmatpush1.bf16.msra.mxu1 %v2844_v10  ;;  %v1546_v7 = vshll.u32 %v3183_v6, 16  ;;  %v2865_v10 = vld [vmem:[%s3892_s1 + $0x148] sm:$0xff]  }
  0x3c   : > { %740 = vmatprep.subr.bf16.mxu0 %v2951_v1  ;;  %916 = vmatprep.subr.bf16.mxu1 %v2951_v1 }
  0x3d   : > { %v1548_v21 = vrot.slane %v1546_v7, 3 }
  0x3e   : > { %493 = vmatmul.mubr.bf16.gmra.mrb[8].mxu0 %v367_v13  ;;  %615 = vmatmul.mubr.bf16.gmra.mrb[8].mxu1 %v3134_v48  ;;  %v1014_v13 = vshll.u32 %v3191_v8, 16  ;;  %v2875_v8 = vld [vmem:[%s3892_s1 + $0x168] sm:$0xff]   ;;  %v2876_v48 = vld [vmem:[%s3892_s1 + $0x1b8] sm:$0xff]  }
  0x3f   : > { %741 = vmatpush1.bf16.msra.mxu0 %v2845_v12  ;;  %917 = vmatpush1.bf16.msra.mxu1 %v2846_v17  ;;  %v659_v12 = vsel %vm649_vm2, %v654_v18, %v658_v20  ;;  %v2866_v17 = vld [vmem:[%s3892_s1 + $0x198] sm:$0xff]   ;;  %v3345_v18 = vor.u32 %v1548_v21, %v1545_v11 }
  0x40   : > { %742 = vmatprep.subr.bf16.mxu0 %v2951_v1  ;;  %918 = vmatprep.subr.bf16.mxu1 %v2951_v1  ;;  %v1016_v26 = vrot.slane %v1014_v13, 2 }
  0x41   : > { %2411 = vmatprep.mubr.msk.bf16.mxu0 %vm434_vm0, %v655_v23  ;;  %2450 = vmatprep.mubr.msk.bf16.mxu1 %vm434_vm0, %v831_v27  ;;  %v835_v23 = vsel %vm649_vm2, %v830_v22, %v3315_v60  ;;  %v3343_v27 = vor.u32 %v1560_v5, %v1557_v0  ;;  %v1019_v22 = vshrl.u32 %v3195_v9, 16  ;;  %v3380_v15 = vsel %vm1538_vm5, %v1541_v43, %v3345_v18 }
  0x42   : > { %v1005_v0 = vshll.u32 %v3263_v40, 16 }
  0x43   : > { %743 = vmatpush1.bf16.msra.mxu0 %v2848_v25  ;;  %919 = vmatpush1.bf16.msra.mxu1 %v2850_v28  ;;  %v832_v25 = vrot.slane %v2418_v63, 1  ;;  %v1739_v28 = vrot.slane %v3072_v19, 3  ;;  %v657_v19 = vsel %vm649_vm2, %v651_v49, %v656_v58  ;;  %v1021_v49 = vrot.slane %v1019_v22, 1 }
  0x44   : > { %744 = vmatprep.subr.bf16.mxu0 %v2951_v1  ;;  %920 = vmatprep.subr.bf16.mxu1 %v2951_v1  ;;  %v1002_v63 = vshrl.u32 %v3263_v40, 16  ;;  %v1007_v13 = vrot.slane %v1005_v0, 2  ;;  %v2902_v0 = vld [vmem:[%s3892_s1 + $0x268] sm:$0xff]  }
  0x45   : > { %v833_v39 = vsel %vm649_vm2, %v827_v51, %v832_v25 }
  0x47   : > { %745 = vmatpush1.bf16.msra.mxu0 %v2851_v29  ;;  %921 = vmatpush1.bf16.msra.mxu1 %v2852_v30  ;;  %v2868_v29 = vld [vmem:[%s3892_s1 + $0x150] sm:$0xff]   ;;  %v1740_v30 = vrot.slane %v3247_v32, 3 }
  0x48   : > { %746 = vmatprep.subr.bf16.mxu0 %v2951_v1  ;;  %922 = vmatprep.subr.bf16.mxu1 %v2951_v1 }
  0x49   : > { %v3364_v34 = vsel %vm1735_vm4, %v1739_v28, %v1740_v30  ;;  %v2883_v28 = vld [vmem:[%s3892_s1 + $0x188] sm:$0xff]  }
  0x4b   : > { %747 = vmatpush1.bf16.msra.mxu0 %v2853_v31  ;;  %923 = vmatpush1.bf16.msra.mxu1 %v2854_v33  ;;  %v1022_v31 = vshll.u32 %v3195_v9, 16  ;;  %v1736_v33 = vrot.slane %v3085_v24, 3  ;;  %v2870_v24 = vld [vmem:[%s3892_s1 + $0x1a0] sm:$0xff]  }
  0x4c   : > { %748 = vmatprep.subr.bf16.mxu0 %v2951_v1  ;;  %924 = vmatprep.subr.bf16.mxu1 %v2951_v1 }
  0x4d   : > { %v1024_v50 = vrot.slane %v1022_v31, 2 }
  0x4f   : > { %749 = vmatpush1.bf16.msra.mxu0 %v2855_v14  ;;  %925 = vmatpush1.bf16.msra.mxu1 %v2856_v16  ;;  %v3373_v14 = vsel %vm1538_vm5, %v1553_v56, %v3343_v27  ;;  %v1737_v16 = vrot.slane %v3183_v6, 3  ;;  %v3402_v52 = vor.u32 %v1024_v50, %v1021_v49  ;;  %v1207_v56 = vsel %vm1201_vm3, %v1205_v47, %v1206_v55  ;;  %v2889_v47 = vld [vmem:[%s3892_s1 + $0x238] sm:$0xff]  }
  0x50   : > { %750 = vmatprep.subr.bf16.mxu0 %v2951_v1  ;;  %926 = vmatprep.subr.bf16.mxu1 %v2951_v1 }
  0x51   : > { %v3387_v51 = vsel %vm1735_vm4, %v1736_v33, %v1737_v16  ;;  %v2884_v33 = vld [vmem:[%s3892_s1 + $0x1d8] sm:$0xff]  }
  0x53   : > { %751 = vmatpush1.bf16.msra.mxu0 %v2857_v46  ;;  %927 = vmatpush1.bf16.msra.mxu1 %v2858_v54  ;;  %v1013_v46 = vrot.slane %v1011_v61, 1  ;;  %v2874_v54 = vld [vmem:[%s3892_s1 + $0x1b0] sm:$0xff]   ;;  %v2879_v61 = vld [vmem:[%s3892_s1 + $0x178] sm:$0xff]  }
  0x54   : > { %1117 = vmatprep.subr.bf16.mxu0 %v2951_v1  ;;  %1284 = vmatprep.subr.bf16.mxu1 %v2951_v1 }
  0x55   : > { %v1017_v43 = vor.u32 %v1016_v26, %v1013_v46  ;;  %v2885_v26 = vld [vmem:[%s3892_s1 + $0x1e0] sm:$0xff]  }
  0x56   : > { %765 = vmatmul.mubr.bf16.vlgmr.msra.gmra.mrb[12].mxu0 %v652_v62  ;;  %941 = vmatmul.mubr.bf16.vlgmr.msra.gmra.mrb[12].mxu1 %v828_v3  ;;  %v997_v62 = vshll.u32 %v3258_v38, 16 }
  0x57   : > { %1118 = vmatpush1.bf16.msra.mxu0 %v2861_v41  ;;  %1285 = vmatpush1.bf16.msra.mxu1 %v2864_v59  ;;  %v3435_v41 = vld [vmem:[%s3044_s24 + $0x30] sm:$0xff]  ;;  %v994_v59 = vshrl.u32 %v3258_v38, 16 }
  0x58   : > { %1119 = vmatprep.subr.bf16.mxu0 %v2951_v1  ;;  %1286 = vmatprep.subr.bf16.mxu1 %v2951_v1  ;;  %v999_v11 = vrot.slane %v997_v62, 2  ;;  %v3465_v21 = vcombine.low %v3178_v4, %v3435_v41  ;;  %v260_v62 = vld [vmem:[%s3044_s24 + $0x38] sm:$0x33] }
  0x59   : > { %2412 = vmatprep.mubr.msk.bf16.mxu0 %vm434_vm0, %v659_v12  ;;  %2451 = vmatprep.mubr.msk.bf16.mxu1 %vm434_vm0, %v835_v23  ;;  %v996_v3 = vrot.slane %v994_v59, 1  ;;  %v1004_v12 = vrot.slane %v1002_v63, 1  ;;  %v2897_v59 = vld [vmem:[%s3892_s1 + $0x208] sm:$0xff]   ;;  %v2900_v63 = vld [vmem:[%s3892_s1 + $0x260] sm:$0xff]  }
  0x5a   : > { %v1031_v31 = vshll.u32 %v3465_v21, 16 }
  0x5b   : > { %1120 = vmatpush1.bf16.msra.mxu0 %v2865_v10  ;;  %1287 = vmatpush1.bf16.msra.mxu1 %v2866_v17  ;;  %v2881_v10 = vld [vmem:[%s3892_s1 + $0x180] sm:$0xff]   ;;  %v2882_v17 = vld [vmem:[%s3892_s1 + $0x1d0] sm:$0xff]   ;;  %v1008_v22 = vor.u32 %v1007_v13, %v1004_v12  ;;  %v2905_v13 = vld [vmem:[%s3892_s1 + $0x228] sm:$0xff]  }
  0x5c   : > { %1121 = vmatprep.subr.bf16.mxu0 %v2951_v1  ;;  %1288 = vmatprep.subr.bf16.mxu1 %v2951_v1  ;;  %v1033_v50 = vrot.slane %v1031_v31, 2 }
  0x5e   : > { %773 = vmatmul.mubr.bf16.gmra.mrb[16].mxu0 %v657_v19  ;;  %949 = vmatmul.mubr.bf16.gmra.mrb[16].mxu1 %v833_v39  ;;  %v1202_v19 = vrot.slane %v3258_v38, 2  ;;  %v1203_v39 = vrot.slane %v3263_v40, 2  ;;  %v2886_v40 = vld [vmem:[%s3892_s1 + $0x230] sm:$0xff]  }
  0x5f   : > { %1122 = vmatpush1.bf16.msra.mxu0 %v2868_v29  ;;  %1289 = vmatpush1.bf16.msra.mxu1 %v2870_v24  ;;  %v1000_v29 = vor.u32 %v999_v11, %v996_v3 }
  0x60   : > { %1123 = vmatprep.subr.bf16.mxu0 %v2951_v1  ;;  %1290 = vmatprep.subr.bf16.mxu1 %v2951_v1  ;;  %v1204_v38 = vsel %vm1201_vm3, %v1202_v19, %v1203_v39 }
  0x61   : > { %2413 = vmatprep.mubr.msk.bf16.mxu0 %vm434_vm0, %v658_v20  ;;  %2452 = vmatprep.mubr.msk.bf16.mxu1 %vm434_vm0, %v3315_v60  ;;  %v1026_v20 = vsel %vm992_vm6, %v1017_v43, %v3402_v52  ;;  %v3445_v60 = vcombine.high %v3178_v4, %v3435_v41  ;;  %v1028_v4 = vshrl.u32 %v3465_v21, 16  ;;  %v1009_v46 = vsel %vm992_vm6, %v1000_v29, %v1008_v22  ;;  %v2887_v43 = vld [vmem:[%s3892_s1 + $0x1e8] sm:$0xff]  }
  0x63   : > { %1124 = vmatpush1.bf16.msra.mxu0 %v2871_v36  ;;  %1291 = vmatpush1.bf16.msra.mxu1 %v2872_v37  ;;  %v1037_v5 = vshrl.u32 %v3445_v60, 16  ;;  %v1040_v7 = vshll.u32 %v3445_v60, 16  ;;  %v1030_v49 = vrot.slane %v1028_v4, 1  ;;  %v1210_v36 = vrot.slane %v3445_v60, 2  ;;  %v2898_v60 = vld [vmem:[%s3892_s1 + $0x258] sm:$0xff]  }
  0x64   : > { %1125 = vmatprep.subr.bf16.mxu0 %v2951_v1  ;;  %1292 = vmatprep.subr.bf16.mxu1 %v2951_v1 }
  0x65   : > { %v1039_v23 = vrot.slane %v1037_v5, 1  ;;  %v2903_v5 = vld [vmem:[%s3892_s1 + $0x220] sm:$0xff]  }
  0x66   : > { %781 = vmatmul.mubr.bf16.gmra.mrb[20].mxu0 %v656_v58  ;;  %957 = vmatmul.mubr.bf16.gmra.mrb[20].mxu1 %v832_v25  ;;  %v2878_v58 = vld [vmem:[%s3892_s1 + $0x1c0] sm:$0xff]   ;;  %v1042_v25 = vrot.slane %v1040_v7, 2  ;;  %v2904_v7 = vld [vmem:[%s3892_s1 + $0x270] sm:$0xff]  }
  0x67   : > { %1126 = vmatpush1.bf16.msra.mxu0 %v2873_v53  ;;  %1293 = vmatpush1.bf16.msra.mxu1 %v2874_v54  ;;  %v1034_v53 = vor.u32 %v1033_v50, %v1030_v49  ;;  %v1211_v54 = vsel %vm1201_vm3, %v1206_v55, %v1210_v36  ;;  %v2891_v55 = vld [vmem:[%s3892_s1 + $0x1f0] sm:$0xff]  }
  0x68   : > { %1127 = vmatprep.subr.bf16.mxu0 %v2951_v1  ;;  %1294 = vmatprep.subr.bf16.mxu1 %v2951_v1  ;;  %v1043_v24 = vor.u32 %v1042_v25, %v1039_v23 }
  0x69   : > { %2485 = vmatprep.mubr.msk.bf16.mxu0 %vm434_vm0, %v1026_v20  ;;  %2518 = vmatprep.mubr.msk.bf16.mxu1 %vm434_vm0, %v1207_v56  ;;  %v1035_v9 = vsel %vm992_vm6, %v1008_v22, %v1034_v53  ;;  %v2893_v56 = vld [vmem:[%s3892_s1 + $0x1f8] sm:$0xff]  }
  0x6a   : > { %v1044_v37 = vsel %vm992_vm6, %v3402_v52, %v1043_v24  ;;  %v1208_v52 = vrot.slane %v3465_v21, 2  ;;  %v2907_v21 = vld [vmem:[%s3892_s1 + $0x278] sm:$0xff]  }
  0x6b   : > { %1128 = vmatpush1.bf16.msra.mxu0 %v2875_v8  ;;  %1295 = vmatpush1.bf16.msra.mxu1 %v2876_v48  ;;  %v2892_v8 = vld [vmem:[%s3892_s1 + $0x240] sm:$0xff]   ;;  %v2894_v48 = vld [vmem:[%s3892_s1 + $0x248] sm:$0xff]  }
  0x6c   : > { %1129 = vmatprep.subr.bf16.mxu0 %v2951_v1  ;;  %1296 = vmatprep.subr.bf16.mxu1 %v2951_v1  ;;  %v1209_v20 = vsel %vm1201_vm3, %v1203_v39, %v1208_v52 }
  0x6f   : > { %1130 = vmatpush1.bf16.msra.mxu0 %v2877_v57  ;;  %1297 = vmatpush1.bf16.msra.mxu1 %v2878_v58  ;;  %v2895_v57 = vld [vmem:[%s3892_s1 + $0x200] sm:$0xff]   ;;  %v2896_v58 = vld [vmem:[%s3892_s1 + $0x250] sm:$0xff]  }
  0x70   : > { %1131 = vmatprep.subr.bf16.mxu0 %v2951_v1  ;;  %1298 = vmatprep.subr.bf16.mxu1 %v2951_v1 }
  0x73   : > { %1132 = vmatpush1.bf16.msra.mxu0 %v2879_v61  ;;  %1299 = vmatpush1.bf16.msra.mxu1 %v2880_v2  ;;  %v2899_v61 = vld [vmem:[%s3892_s1 + $0x210] sm:$0xff]  }
  0x74   : > { %1133 = vmatprep.subr.bf16.mxu0 %v2951_v1  ;;  %1300 = vmatprep.subr.bf16.mxu1 %v2951_v1 }
  0x77   : > { %1134 = vmatpush1.bf16.msra.mxu0 %v2881_v10  ;;  %1301 = vmatpush1.bf16.msra.mxu1 %v2882_v17  ;;  %v3581_v10 = vcombine.low %v3435_v41, %v260_v62 }
  0x78   : > { %1135 = vmatprep.subr.bf16.mxu0 %v2951_v1  ;;  %1302 = vmatprep.subr.bf16.mxu1 %v2951_v1 }
  0x79   : > { %v1564_v17 = vshrl.u32 %v3581_v10, 16  ;;  %v1380_v19 = vrot.slane %v3581_v10, 2 }
  0x7b   : > { %1136 = vmatpush1.bf16.msra.mxu0 %v2883_v28  ;;  %1303 = vmatpush1.bf16.msra.mxu1 %v2884_v33  ;;  %v2909_v28 = vld [vmem:[%s3892_s1 + $0x280] sm:$0xff]   ;;  %v1566_v29 = vrot.slane %v1564_v17, 2  ;;  %v2910_v33 = vld [vmem:[%s3892_s1 + $0x288] sm:$0xff]   ;;  %v2012_v17 = vld [vmem:[%s3896_s5 + $0x18] sm:$0xff] }
  0x7c   : > { %1456 = vmatprep.subr.bf16.mxu0 %v2951_v1  ;;  %1653 = vmatprep.subr.bf16.mxu1 %v2951_v1 }
  0x7e   : > { %1150 = vmatmul.mubr.bf16.vlgmr.msra.gmra.mrb[24].mxu0 %v1009_v46  ;;  %1317 = vmatmul.mubr.bf16.vlgmr.msra.gmra.mrb[24].mxu1 %v1204_v38  ;;  %v2918_v46 = vld [vmem:[%s3892_s1 + $0x2b8] sm:$0xff]  }
  0x7f   : > { %1457 = vmatpush1.bf16.msra.mxu0 %v2885_v26  ;;  %1654 = vmatpush1.bf16.msra.mxu1 %v2886_v40  ;;  %v2919_v26 = vld [vmem:[%s3892_s1 + $0x2c0] sm:$0xff]  }
  0x80   : > { %1458 = vmatprep.subr.bf16.mxu0 %v2951_v1  ;;  %1655 = vmatprep.subr.bf16.mxu1 %v2951_v1 }
  0x81   : > { %2486 = vmatprep.mubr.msk.bf16.mxu0 %vm434_vm0, %v1044_v37  ;;  %2519 = vmatprep.mubr.msk.bf16.mxu1 %vm434_vm0, %v1211_v54 }
  0x83   : > { %1459 = vmatpush1.bf16.msra.mxu0 %v2887_v43  ;;  %1656 = vmatpush1.bf16.msra.mxu1 %v2889_v47 }
  0x84   : > { %1460 = vmatprep.subr.bf16.mxu0 %v2951_v1  ;;  %1657 = vmatprep.subr.bf16.mxu1 %v2951_v1 }
  0x86   : > { %1158 = vmatmul.mubr.bf16.gmra.mrb[28].mxu0 %v1035_v9  ;;  %1325 = vmatmul.mubr.bf16.gmra.mrb[28].mxu1 %v1209_v20 }
  0x87   : > { %1461 = vmatpush1.bf16.msra.mxu0 %v2891_v55  ;;  %1658 = vmatpush1.bf16.msra.mxu1 %v2892_v8 }
  0x88   : > { %1462 = vmatprep.subr.bf16.mxu0 %v2951_v1  ;;  %1659 = vmatprep.subr.bf16.mxu1 %v2951_v1 }
  0x89   : > { %2487 = vmatprep.mubr.msk.bf16.mxu0 %vm434_vm0, %v1043_v24  ;;  %2520 = vmatprep.mubr.msk.bf16.mxu1 %vm434_vm0, %v1210_v36  ;;  %v2917_v24 = vld [vmem:[%s3892_s1 + $0x2b0] sm:$0xff]   ;;  %v1742_v36 = vrot.slane %v3581_v10, 3 }
  0x8b   : > { %1463 = vmatpush1.bf16.msra.mxu0 %v2893_v56  ;;  %1660 = vmatpush1.bf16.msra.mxu1 %v2894_v48  ;;  %v1743_v38 = vsel %vm1735_vm4, %v1737_v16, %v1742_v36 }
  0x8c   : > { %1464 = vmatprep.subr.bf16.mxu0 %v2951_v1  ;;  %1661 = vmatprep.subr.bf16.mxu1 %v2951_v1 }
  0x8e   : > { %1166 = vmatmul.mubr.bf16.gmra.mrb[32].mxu0 %v1034_v53  ;;  %1333 = vmatmul.mubr.bf16.gmra.mrb[32].mxu1 %v1208_v52 }
  0x8f   : > { %1465 = vmatpush1.bf16.msra.mxu0 %v2895_v57  ;;  %1662 = vmatpush1.bf16.msra.mxu1 %v2896_v58 }
  0x90   : > { %1466 = vmatprep.subr.bf16.mxu0 %v2951_v1  ;;  %1663 = vmatprep.subr.bf16.mxu1 %v2951_v1 }
  0x91   : > { %2555 = vmatprep.mubr.msk.bf16.mxu0 %vm434_vm0, %v3268_v44  ;;  %2588 = vmatprep.mubr.msk.bf16.mxu1 %vm434_vm0, %v3373_v14  ;;  %v3561_v44 = vcombine.high %v3435_v41, %v260_v62  ;;  %v2901_v14 = vld [vmem:[%s3892_s1 + $0x218] sm:$0xff]   ;;  %v1567_v41 = vshll.u32 %v3581_v10, 16 }
  0x93   : > { %1467 = vmatpush1.bf16.msra.mxu0 %v2897_v59  ;;  %1664 = vmatpush1.bf16.msra.mxu1 %v2898_v60  ;;  %v1573_v2 = vshrl.u32 %v3561_v44, 16  ;;  %v1576_v3 = vshll.u32 %v3561_v44, 16  ;;  %v1382_v23 = vrot.slane %v3561_v44, 2  ;;  %v1569_v22 = vrot.slane %v1567_v41, 3 }
  0x94   : > { %1468 = vmatprep.subr.bf16.mxu0 %v2951_v1  ;;  %1665 = vmatprep.subr.bf16.mxu1 %v2951_v1  ;;  %v1744_v49 = vrot.slane %v3561_v44, 3 }
  0x95   : > { %v1575_v11 = vrot.slane %v1573_v2, 2  ;;  %v1578_v12 = vrot.slane %v1576_v3, 3  ;;  %v1383_v4 = vsel %vm1201_vm3, %v1378_v35, %v1382_v23  ;;  %v1570_v39 = vor.u32 %v1569_v22, %v1566_v29  ;;  %v2009_v2 = vld [vmem:[%s3896_s5] sm:$0xff]  ;;  %v2010_v3 = vld [vmem:[%s3896_s5 + $0x8] sm:$0xff] }
  0x96   : > { %v1381_v35 = vsel %vm1201_vm3, %v1375_v45, %v1380_v19  ;;  %v2915_v45 = vld [vmem:[%s3892_s1 + $0x2a0] sm:$0xff]   ;;  %v1745_v50 = vsel %vm1735_vm4, %v1740_v30, %v1744_v49 }
  0x97   : > { %1469 = vmatpush1.bf16.msra.mxu0 %v2899_v61  ;;  %1666 = vmatpush1.bf16.msra.mxu1 %v2900_v63  ;;  %v1579_v25 = vor.u32 %v1578_v12, %v1575_v11 }
  0x98   : > { %1470 = vmatprep.subr.bf16.mxu0 %v2951_v1  ;;  %1667 = vmatprep.subr.bf16.mxu1 %v2951_v1 }
  0x99   : > { %v1580_v31 = vsel %vm1538_vm5, %v3343_v27, %v1579_v25  ;;  %v1571_v27 = vsel %vm1538_vm5, %v3345_v18, %v1570_v39  ;;  %v2916_v18 = vld [vmem:[%s3892_s1 + $0x2a8] sm:$0xff]  }
  0x9b   : > { %1471 = vmatpush1.bf16.msra.mxu0 %v2901_v14  ;;  %1668 = vmatpush1.bf16.msra.mxu1 %v2902_v0 }
  0x9c   : > { %1472 = vmatprep.subr.bf16.mxu0 %v2951_v1  ;;  %1669 = vmatprep.subr.bf16.mxu1 %v2951_v1 }
  0x9f   : > { %1473 = vmatpush1.bf16.msra.mxu0 %v2903_v5  ;;  %1670 = vmatpush1.bf16.msra.mxu1 %v2904_v7  ;;  %v3671_v5 = vpack.c.bf16 %v2010_v3, %v2009_v2  ;;  %v2952_v7 = vmov 0.0|0.0  }
  0xa0   : > { %1474 = vmatprep.subr.bf16.mxu0 %v2951_v1  ;;  %1671 = vmatprep.subr.bf16.mxu1 %v2951_v1 }
  0xa3   : > { %1475 = vmatpush1.bf16.msra.mxu0 %v2905_v13  ;;  %1672 = vmatpush1.bf16.msra.mxu1 %v2907_v21  ;;  %v2011_v21 = vld [vmem:[%s3896_s5 + $0x10] sm:$0xff] }
  0xa4   : > { %1818 = vmatprep.subr.bf16.mxu0 %v2951_v1  ;;  %2742 = vmatprep.subr.bf16.mxu1 %v2952_v7 }
  0xa6   : > { %1489 = vmatmul.mubr.bf16.vlgmr.msra.gmra.mrb[36].mxu0 %v3285_v42  ;;  %1686 = vmatmul.mubr.bf16.vlgmr.msra.gmra.mrb[36].mxu1 %v3380_v15  ;;  %v2913_v42 = vld [vmem:[%s3892_s1 + $0x290] sm:$0xff]   ;;  %v2914_v15 = vld [vmem:[%s3892_s1 + $0x298] sm:$0xff]  }
  0xa7   : > { %1819 = vmatpush1.bf16.msra.mxu0 %v2909_v28  ;;  %2556 = vmatprep.mubr.msk.bf16.mxu0 %vm434_vm0, %v1383_v4 }
  0xa8   : > { %1820 = vmatprep.subr.bf16.mxu0 %v2951_v1  ;;  %2589 = vmatprep.mubr.msk.bf16.mxu1 %vm434_vm0, %v1580_v31 }
  0xa9   : > { %2744 = vmatpush3.bf16.msra.mxu1 %v3671_v5 }
  0xaa   : > { %2745 = vmatprep.subr.bf16.mxu1 %v2952_v7 }
  0xab   : > { %1821 = vmatpush1.bf16.msra.mxu0 %v2910_v33 }
  0xac   : > { %1822 = vmatprep.subr.bf16.mxu0 %v2951_v1 }
  0xae   : > { %1497 = vmatmul.mubr.bf16.gmra.mrb[40].mxu0 %v1381_v35  ;;  %1694 = vmatmul.mubr.bf16.gmra.mrb[40].mxu1 %v1571_v27 }
  0xaf   : > { %1823 = vmatpush1.bf16.msra.mxu0 %v2913_v42  ;;  %2557 = vmatprep.mubr.msk.bf16.mxu0 %vm434_vm0, %v1382_v23 }
  0xb0   : > { %1824 = vmatprep.subr.bf16.mxu0 %v2951_v1  ;;  %2590 = vmatprep.mubr.msk.bf16.mxu1 %vm434_vm0, %v1579_v25  ;;  %v3682_v25 = vpack.c.bf16 %v2012_v17, %v2011_v21 }
  0xb2   : > { %2747 = vmatpush3.bf16.msra.mxu1 %v3682_v25 }
  0xb3   : > { %1825 = vmatpush1.bf16.msra.mxu0 %v2914_v15  ;;  %2748 = vmatprep.subr.bf16.mxu1 %v2952_v7 }
  0xb4   : > { %1826 = vmatprep.subr.bf16.mxu0 %v2951_v1 }
  0xb6   : > { %1505 = vmatmul.mubr.bf16.gmra.mrb[44].mxu0 %v1380_v19  ;;  %1702 = vmatmul.mubr.bf16.gmra.mrb[44].mxu1 %v1570_v39  ;;  %v2013_v19 = vld [vmem:[%s3896_s5 + $0x20] sm:$0xff]  ;;  %v2014_v39 = vld [vmem:[%s3896_s5 + $0x28] sm:$0xff] }
  0xb7   : > { %1827 = vmatpush1.bf16.msra.mxu0 %v2915_v45  ;;  %2621 = vmatprep.mubr.msk.bf16.mxu0 %vm434_vm0, %v3364_v34  ;;  %v2920_v34 = vld [vmem:[%s3892_s1 + $0x2c8] sm:$0xff]   ;;  %v3696_v35 = vpack.c.bf16 %v2014_v39, %v2013_v19 }
  0xb8   : > { %1828 = vmatprep.subr.bf16.mxu0 %v2951_v1 }
  0xb9   : > { %2750 = vmatpush3.bf16.msra.mxu1 %v3696_v35 }
  0xba   : > { %2751 = vmatprep.subr.bf16.mxu1 %v2952_v7 }
  0xbb   : > { %1829 = vmatpush1.bf16.msra.mxu0 %v2916_v18  ;;  %v2015_v18 = vld [vmem:[%s3896_s5 + $0x30] sm:$0xff] }
  0xbc   : > { %1830 = vmatprep.subr.bf16.mxu0 %v2951_v1 }
  0xbf   : > { %1831 = vmatpush1.bf16.msra.mxu0 %v2917_v24  ;;  %v2016_v24 = vld [vmem:[%s3896_s5 + $0x38] sm:$0xff] }
  0xc0   : > { %1832 = vmatprep.subr.bf16.mxu0 %v2951_v1 }
  0xc3   : > { %1833 = vmatpush1.bf16.msra.mxu0 %v2918_v46 }
  0xc4   : > { %1834 = vmatprep.subr.bf16.mxu0 %v2951_v1 }
  0xc7   : > { %1835 = vmatpush1.bf16.msra.mxu0 %v2919_v26 }
  0xc8   : > { %1836 = vmatprep.subr.bf16.mxu0 %v2951_v1 }
  0xcb   : > { %1837 = vmatpush1.bf16.msra.mxu0 %v2920_v34 }
  0xce   : > { %1851 = vmatmul.mubr.bf16.vlgmr.msra.gmra.mrb[48].mxu0 %v3387_v51 }
  0xcf   : > { %2622 = vmatprep.mubr.msk.bf16.mxu0 %vm434_vm0, %v1745_v50 }
  0xd6   : > { %1859 = vmatmul.mubr.bf16.gmra.mrb[52].mxu0 %v1743_v38  ;;  %v3706_v38 = vpack.c.bf16 %v2016_v24, %v2015_v18 }
  0xd7   : > { %2623 = vmatprep.mubr.msk.bf16.mxu0 %vm434_vm0, %v1744_v49 }
  0xd8   : > { %2753 = vmatpush3.bf16.msra.mxu1 %v3706_v38 }
  0xd9   : > { %2754 = vmatprep.subr.bf16.mxu1 %v2952_v7 }
  0xde   : > { %1867 = vmatmul.mubr.bf16.gmra.mrb[56].mxu0 %v1742_v36 }
 0x101   : > { %v478_v1 = vpop.f32.mrb[0].mxu0  ;;  %v600_v40 = vpop.f32.mrb[0].mxu1 }
 0x102   : > { %v480_v37 = vpop.f32.mrb[1].mxu0  ;;  %v601_v32 = vadd.f32 %v600_v40, %v478_v1  ;;  %v602_v43 = vpop.f32.mrb[1].mxu1 }
 0x103   : > { %v481_v30 = vpop.f32.mrb[2].mxu0  ;;  %v603_v53 = vpop.f32.mrb[2].mxu1  ;;  %v2017_v37 = vld [vmem:[%s3896_s5 + $0x40] sm:$0xff] }
 0x104   : > { %v483_v51 = vpop.f32.mrb[3].mxu0  ;;  %v604_v54 = vadd.f32 %v603_v53, %v481_v30  ;;  %v605_v47 = vpop.f32.mrb[3].mxu1 }
 0x105   : > { %v2019_v47 = vld [vmem:[%s3896_s5 + $0x50] sm:$0xff] }
 0x109   : > { %v486_v52 = vpop.f32.mrb[4].mxu0  ;;  %v608_v55 = vpop.f32.mrb[4].mxu1 }
 0x10a   : > { %v488_v9 = vpop.f32.mrb[5].mxu0  ;;  %v609_v6 = vadd.f32 %v608_v55, %v486_v52  ;;  %v610_v16 = vpop.f32.mrb[5].mxu1  ;;  %v2020_v52 = vld [vmem:[%s3896_s5 + $0x58] sm:$0xff] }
 0x10b   : > { %v489_v20 = vpop.f32.mrb[6].mxu0  ;;  %v611_v56 = vpop.f32.mrb[6].mxu1 }
 0x10c   : > { %v491_v8 = vpop.f32.mrb[7].mxu0  ;;  %v612_v48 = vadd.f32 %v611_v56, %v489_v20  ;;  %v613_v57 = vpop.f32.mrb[7].mxu1 }
 0x10d   : > { %v2022_v57 = vld [vmem:[%s3896_s5 + $0x68] sm:$0xff] }
 0x111   : > { %v494_v58 = vpop.f32.mrb[8].mxu0  ;;  %v616_v60 = vpop.f32.mrb[8].mxu1 }
 0x112   : > { %v496_v59 = vpop.f32.mrb[9].mxu0  ;;  %v617_v62 = vadd.f32 %v616_v60, %v494_v58  ;;  %v618_v63 = vpop.f32.mrb[9].mxu1  ;;  %v2024_v60 = vld [vmem:[%s3896_s5 + $0x78] sm:$0xff] }
 0x113   : > { %v497_v61 = vpop.f32.mrb[10].mxu0  ;;  %v619_v14 = vpop.f32.mrb[10].mxu1  ;;  %v2023_v59 = vld [vmem:[%s3896_s5 + $0x70] sm:$0xff] }
 0x114   : > { %v498_v44 = vpop.f32.mrb[11].mxu0  ;;  %v620_v0 = vpop.f32.mrb[11].mxu1  ;;  %v2954_v61 = vmov 0.0  }
 0x115   : > { %2704 = vmatprep.mubr.msk.f32.mxu1 %vm2953_vm7, %v2954_v61 }
 0x129   : > { %v766_v10 = vpop.f32.mrb[12].mxu0  ;;  %v942_v13 = vpop.f32.mrb[12].mxu1 }
 0x12a   : > { %v788_v11 = vadd.f32 %v766_v10, %v601_v32  ;;  %v768_v12 = vpop.f32.mrb[13].mxu0  ;;  %v944_v23 = vpop.f32.mrb[13].mxu1  ;;  %v2018_v32 = vld [vmem:[%s3896_s5 + $0x48] sm:$0xff] }
 0x12b   : > { %v769_v41 = vpop.f32.mrb[14].mxu0  ;;  %v945_v4 = vpop.f32.mrb[14].mxu1  ;;  %v3716_v43 = vpack.c.bf16 %v2018_v32, %v2017_v37 }
 0x12c   : > { %v789_v28 = vadd.f32 %v769_v41, %v604_v54  ;;  %v3684_v29 = vadd.f32 %v942_v13, %v788_v11  ;;  %v771_v22 = vpop.f32.mrb[15].mxu0  ;;  %v947_v31 = vpop.f32.mrb[15].mxu1 }
 0x12d   : > { %2756 = vmatpush3.bf16.msra.mxu1 %v3716_v43 }
 0x12e   : > { %v3687_v33 = vadd.f32 %v945_v4, %v789_v28  ;;  %2757 = vmatprep.subr.bf16.mxu1 %v2952_v7 }
 0x131   : > { %v774_v42 = vpop.f32.mrb[16].mxu0  ;;  %v950_v45 = vpop.f32.mrb[16].mxu1 }
 0x132   : > { %v790_v27 = vadd.f32 %v774_v42, %v609_v6  ;;  %v776_v15 = vpop.f32.mrb[17].mxu0  ;;  %v952_v26 = vpop.f32.mrb[17].mxu1  ;;  %v3726_v6 = vpack.c.bf16 %v2020_v52, %v2019_v47 }
 0x133   : > { %v777_v46 = vpop.f32.mrb[18].mxu0  ;;  %v953_v50 = vpop.f32.mrb[18].mxu1 }
 0x134   : > { %v791_v34 = vadd.f32 %v777_v46, %v612_v48  ;;  %v966_v49 = vadd.f32 %v950_v45, %v790_v27  ;;  %v779_v36 = vpop.f32.mrb[19].mxu0  ;;  %v955_v1 = vpop.f32.mrb[19].mxu1  ;;  %2759 = vmatpush3.bf16.msra.mxu1 %v3726_v6  ;;  %v2021_v48 = vld [vmem:[%s3896_s5 + $0x60] sm:$0xff] }
 0x135   : > { %2760 = vmatprep.subr.bf16.mxu1 %v2952_v7  ;;  %v3736_v58 = vpack.c.bf16 %v2022_v57, %v2021_v48 }
 0x136   : > { %v967_v40 = vadd.f32 %v953_v50, %v791_v34 }
 0x138   : > { %2762 = vmatpush3.bf16.msra.mxu1 %v3736_v58 }
 0x139   : > { %v782_v30 = vpop.f32.mrb[20].mxu0  ;;  %v958_v51 = vpop.f32.mrb[20].mxu1  ;;  %2763 = vmatprep.subr.bf16.mxu1 %v2952_v7 }
 0x13a   : > { %v792_v53 = vadd.f32 %v782_v30, %v617_v62  ;;  %v784_v54 = vpop.f32.mrb[21].mxu0  ;;  %v960_v55 = vpop.f32.mrb[21].mxu1  ;;  %v3747_v62 = vpack.c.bf16 %v2024_v60, %v2023_v59 }
 0x13b   : > { %v785_v9 = vpop.f32.mrb[22].mxu0  ;;  %v961_v8 = vpop.f32.mrb[22].mxu1 }
 0x13c   : > { %v968_v20 = vadd.f32 %v958_v51, %v792_v53  ;;  %v786_v16 = vpop.f32.mrb[23].mxu0  ;;  %v962_v56 = vpop.f32.mrb[23].mxu1  ;;  %2765 = vmatpush3.bf16.msra.mxu1 %v3747_v62 }
 0x13d   : > { %2766 = vmatprep.subr.bf16.mxu1 %v2952_v7 }
 0x151   : > { %v1151_v63 = vpop.f32.mrb[24].mxu0  ;;  %v1318_v0 = vpop.f32.mrb[24].mxu1 }
 0x152   : > { %v1173_v44 = vadd.f32 %v1151_v63, %v3684_v29  ;;  %v1153_v14 = vpop.f32.mrb[25].mxu0  ;;  %v1320_v3 = vpop.f32.mrb[25].mxu1 }
 0x153   : > { %v1154_v2 = vpop.f32.mrb[26].mxu0  ;;  %v1321_v13 = vpop.f32.mrb[26].mxu1 }
 0x154   : > { %v1174_v10 = vadd.f32 %v1154_v2, %v3687_v33  ;;  %v1340_v11 = vadd.f32 %v1318_v0, %v1173_v44  ;;  %v1156_v12 = vpop.f32.mrb[27].mxu0  ;;  %v1323_v21 = vpop.f32.mrb[27].mxu1 }
 0x156   : > { %v1341_v17 = vadd.f32 %v1321_v13, %v1174_v10 }
 0x159   : > { %v1159_v41 = vpop.f32.mrb[28].mxu0  ;;  %v1326_v22 = vpop.f32.mrb[28].mxu1 }
 0x15a   : > { %v1175_v23 = vadd.f32 %v1159_v41, %v966_v49  ;;  %v1161_v28 = vpop.f32.mrb[29].mxu0  ;;  %v1328_v31 = vpop.f32.mrb[29].mxu1 }
 0x15b   : > { %v1162_v4 = vpop.f32.mrb[30].mxu0  ;;  %v1329_v29 = vpop.f32.mrb[30].mxu1 }
 0x15c   : > { %v1176_v19 = vadd.f32 %v1162_v4, %v967_v40  ;;  %v1342_v39 = vadd.f32 %v1326_v22, %v1175_v23  ;;  %v1164_v42 = vpop.f32.mrb[31].mxu0  ;;  %v1331_v27 = vpop.f32.mrb[31].mxu1 }
 0x15e   : > { %v1343_v15 = vadd.f32 %v1329_v29, %v1176_v19 }
 0x161   : > { %v1167_v45 = vpop.f32.mrb[32].mxu0  ;;  %v1334_v33 = vpop.f32.mrb[32].mxu1 }
 0x162   : > { %v1177_v18 = vadd.f32 %v1167_v45, %v968_v20  ;;  %v1169_v24 = vpop.f32.mrb[33].mxu0  ;;  %v1336_v26 = vpop.f32.mrb[33].mxu1  ;;  %v1891_v20 = vlaneseq }
 0x163   : > { %v1170_v46 = vpop.f32.mrb[34].mxu0  ;;  %v1337_v36 = vpop.f32.mrb[34].mxu1 }
 0x164   : > { %v1344_v34 = vadd.f32 %v1334_v33, %v1177_v18  ;;  %v1171_v50 = vpop.f32.mrb[35].mxu0  ;;  %v1338_v49 = vpop.f32.mrb[35].mxu1  ;;  %v3758_v57 = vshrl.u32 %v1891_v20, 7 }
 0x166   : > { %v1893_v10 = vadd.s32 8, %v3758_v57  ;;  %v3770_v22 = vmul.u32.u64.low 3435973837, %v3758_v57  ;;  %v3771_v4 = vmul.u32.u64.high 3435973837, %v3758_v57, %v3770_v22  ;;  %v1895_v27 = vadd.s32 24, %v3758_v57 }
 0x167   : > { %v1896_v18 = vadd.s32 32, %v3758_v57 }
 0x168   : > { %v3766_v41 = vmul.u32.u64.low 3435973837, %v1893_v10  ;;  %v3767_v23 = vmul.u32.u64.high 3435973837, %v1893_v10, %v3766_v41  ;;  %v3780_v33 = vmul.u32.u64.low 3435973837, %v1895_v27  ;;  %v3781_v24 = vmul.u32.u64.high 3435973837, %v1895_v27, %v3780_v33 }
 0x169   : > { %v1903_v26 = vshrl.u32 %v3771_v4, 3 }
 0x16a   : > { %v1914_v46 = vshrl.u32 %v3767_v23, 3 }
 0x16c   : > { %v1915_v49 = vmul.u32 10, %v1914_v46 }
 0x179   : > { %v1490_v1 = vpop.f32.mrb[36].mxu0  ;;  %v1687_v30 = vpop.f32.mrb[36].mxu1 }
 0x17a   : > { %v1512_v37 = vadd.f32 %v1490_v1, %v1340_v11  ;;  %v1492_v32 = vpop.f32.mrb[37].mxu0  ;;  %v1689_v53 = vpop.f32.mrb[37].mxu1  ;;  %v1894_v11 = vadd.s32 16, %v3758_v57  ;;  %v1904_v1 = vmul.u32 10, %v1903_v26 }
 0x17b   : > { %v1493_v40 = vpop.f32.mrb[38].mxu0  ;;  %v1690_v52 = vpop.f32.mrb[38].mxu1  ;;  %v1936_v32 = vshrl.u32 %v3781_v24, 3 }
 0x17c   : > { %v1513_v51 = vadd.f32 %v1493_v40, %v1341_v17  ;;  %v3754_v54 = vadd.f32 %v1687_v30, %v1512_v37  ;;  %v1495_v47 = vpop.f32.mrb[39].mxu0  ;;  %v1692_v9 = vpop.f32.mrb[39].mxu1  ;;  %v3775_v29 = vmul.u32.u64.low 3435973837, %v1894_v11  ;;  %v3776_v42 = vmul.u32.u64.high 3435973837, %v1894_v11, %v3775_v29 }
 0x17d   : > { %v1916_v30 = vsub.s32 %v1893_v10, %v1915_v49  ;;  %v1905_v40 = vsub.s32 %v3758_v57, %v1904_v1  ;;  %v1937_v47 = vmul.u32 10, %v1936_v32 }
 0x17e   : > { %v3756_v55 = vadd.f32 %v1690_v52, %v1513_v51  ;;  %v1925_v36 = vshrl.u32 %v3776_v42, 3 }
 0x17f   : > { %vm1953_vm8 = vcmp.ne.s32.totalorder %v1916_v30, 0  ;;  %vm1958_vm9 = vcmp.lt.s32.totalorder %v1916_v30, 0  ;;  %vm1952_vm10 = vcmp.ne.s32.totalorder %v1905_v40, 0  ;;  %vm1957_vm11 = vcmp.lt.s32.totalorder %v1905_v40, 0 }
 0x180   : > { %v1926_v37 = vmul.u32 10, %v1925_v36  ;;  %v1968_v9 = vadd.s32 10, %v1916_v30  ;;  %v1938_v20 = vsub.s32 %v1895_v27, %v1937_v47  ;;  %vm3792_vm14 = vmand %vm1958_vm9, %vm1953_vm8 }
 0x181   : > { %v1498_v16 = vpop.f32.mrb[40].mxu0  ;;  %v1695_v48 = vpop.f32.mrb[40].mxu1  ;;  %vm3797_vm15 = vmand %vm1957_vm11, %vm1952_vm10 }
 0x182   : > { %v1514_v8 = vadd.f32 %v1498_v16, %v1342_v39  ;;  %v1500_v56 = vpop.f32.mrb[41].mxu0  ;;  %v1697_v60 = vpop.f32.mrb[41].mxu1  ;;  %v1927_v51 = vsub.s32 %v1894_v11, %v1926_v37  ;;  %v1973_v11 = vsel %vm3792_vm14, %v1968_v9, %v1916_v30  ;;  %vm1955_vm1 = vcmp.ne.s32.totalorder %v1938_v20, 0 }
 0x183   : > { %v1501_v59 = vpop.f32.mrb[42].mxu0  ;;  %v1698_v14 = vpop.f32.mrb[42].mxu1  ;;  %vm1960_vm2 = vcmp.lt.s32.totalorder %v1938_v20, 0  ;;  %vm1978_vm4 = vcmp.lt.s32.totalorder %v1973_v11, 8 }
 0x184   : > { %v1515_v63 = vadd.f32 %v1501_v59, %v1343_v15  ;;  %v3760_v44 = vadd.f32 %v1695_v48, %v1514_v8  ;;  %v1503_v0 = vpop.f32.mrb[43].mxu0  ;;  %v1700_v2 = vpop.f32.mrb[43].mxu1  ;;  %vm1954_vm12 = vcmp.ne.s32.totalorder %v1927_v51, 0  ;;  %vm1959_vm13 = vcmp.lt.s32.totalorder %v1927_v51, 0  ;;  %vm3812_vm5 = vmand %vm1960_vm2, %vm1955_vm1 }
 0x185   : > { %v1967_v59 = vadd.s32 10, %v1905_v40  ;;  %vm3801_vm0 = vmand %vm1959_vm13, %vm1954_vm12  ;;  %v3822_v22 = vsel %vm1978_vm4, 1.0, %v2954_v61 }
 0x186   : > { %v3762_v3 = vadd.f32 %v1698_v14, %v1515_v63  ;;  %v1969_v63 = vadd.s32 10, %v1927_v51 }
 0x189   : > { %v1506_v12 = vpop.f32.mrb[44].mxu0  ;;  %v1703_v21 = vpop.f32.mrb[44].mxu1 }
 0x18a   : > { %v1516_v13 = vadd.f32 %v1506_v12, %v1344_v34  ;;  %v1508_v17 = vpop.f32.mrb[45].mxu0  ;;  %v1705_v31 = vpop.f32.mrb[45].mxu1  ;;  %v3785_v34 = vmul.u32.u64.low 3435973837, %v1896_v18  ;;  %v3786_v50 = vmul.u32.u64.high 3435973837, %v1896_v18, %v3785_v34 }
 0x18b   : > { %v1509_v28 = vpop.f32.mrb[46].mxu0  ;;  %v1706_v15 = vpop.f32.mrb[46].mxu1 }
 0x18c   : > { %v3773_v19 = vadd.f32 %v1703_v21, %v1516_v13  ;;  %v1510_v39 = vpop.f32.mrb[47].mxu0  ;;  %v1707_v45 = vpop.f32.mrb[47].mxu1  ;;  %v1947_v53 = vshrl.u32 %v3786_v50, 3  ;;  %v1974_v13 = vsel %vm3801_vm0, %v1969_v63, %v1927_v51  ;;  %v1970_v21 = vadd.s32 10, %v1938_v20 }
 0x18d   : > { %vm1979_vm10 = vcmp.lt.s32.totalorder %v1974_v13, 8 }
 0x18e   : > { %v1948_v52 = vmul.u32 10, %v1947_v53  ;;  %v1975_v39 = vsel %vm3812_vm5, %v1970_v21, %v1938_v20  ;;  %v2627_v45 = vsel %vm1979_vm10, 1.0, %v2954_v61 }
 0x18f   : > { %vm1980_vm12 = vcmp.lt.s32.totalorder %v1975_v39, 8 }
 0x190   : > { %v1949_v2 = vsub.s32 %v1896_v18, %v1948_v52  ;;  %v2628_v50 = vsel %vm1980_vm12, 1.0, %v2954_v61 }
 0x192   : > { %vm1956_vm6 = vcmp.ne.s32.totalorder %v1949_v2, 0  ;;  %vm1961_vm8 = vcmp.lt.s32.totalorder %v1949_v2, 0  ;;  %v1971_v28 = vadd.s32 10, %v1949_v2 }
 0x193   : > { %vm1966_vm11 = vmand %vm1961_vm8, %vm1956_vm6 }
 0x194   : > { %v1976_v24 = vsel %vm1966_vm11, %v1971_v28, %v1949_v2 }
 0x195   : > { %vm1981_vm13 = vcmp.lt.s32.totalorder %v1976_v24, 8 }
 0x196   : > { %v2629_v30 = vsel %vm1981_vm13, 1.0, %v2954_v61 }
 0x1a1   : > { %v1852_v16 = vpop.f32.mrb[48].mxu0 }
 0x1a2   : > { %v1874_v56 = vadd.f32 %v1852_v16, %v3754_v54  ;;  %v1854_v60 = vpop.f32.mrb[49].mxu0  ;;  %v1972_v54 = vsel %vm3797_vm15, %v1967_v59, %v1905_v40 }
 0x1a3   : > { %v1855_v14 = vpop.f32.mrb[50].mxu0  ;;  %vm1977_vm9 = vcmp.lt.s32.totalorder %v1972_v54, 8 }
 0x1a4   : > { %v1875_v10 = vadd.f32 %v1855_v14, %v3756_v55  ;;  %v1857_v12 = vpop.f32.mrb[51].mxu0  ;;  %v2624_v55 = vld [vmem:[%s3893_s2] ss:$0 sm:$0xff]  ;;  %v2625_v27 = vsel %vm1977_vm9, 1.0, %v2954_v61 }
 0x1a5   : > { %v3827_v29 = vadd.f32 %v2624_v55, %v1874_v56 }
 0x1a6   : > { %v3819_v41 = vadd.f32 %v2624_v55, %v1875_v10 }
 0x1a7   : > { %v1992_v46 = vmul.f32 %v2625_v27, %v3827_v29 }
 0x1a9   : > { %v1860_v23 = vpop.f32.mrb[52].mxu0 }
 0x1aa   : > { %v1876_v4 = vadd.f32 %v1860_v23, %v3760_v44  ;;  %v1862_v31 = vpop.f32.mrb[53].mxu0  ;;  %v1993_v44 = vmul.f32 %v3822_v22, %v3819_v41 }
 0x1ab   : > { %v1863_v42 = vpop.f32.mrb[54].mxu0 }
 0x1ac   : > { %v3830_v15 = vadd.f32 %v2624_v55, %v1876_v4  ;;  %v1877_v18 = vadd.f32 %v1863_v42, %v3762_v3  ;;  %v1865_v33 = vpop.f32.mrb[55].mxu0  ;;  %v1997_v36 = vadd.f32 %v1993_v44, %v1992_v46  ;;  %v2197_v44 = vld [vmem:[%s3894_s3] sm:$0x1] }
 0x1ae   : > { %v1994_v26 = vmul.f32 %v2627_v45, %v3830_v15  ;;  %v3838_v34 = vadd.f32 %v2624_v55, %v1877_v18 }
 0x1b0   : > { %v1998_v37 = vadd.f32 %v1997_v36, %v1994_v26  ;;  %v1995_v32 = vmul.f32 %v2628_v50, %v3838_v34  ;;  %v2201_v26 = vld [vmem:[%s3895_s4] sm:$0x1] }
 0x1b1   : > { %v1868_v49 = vpop.f32.mrb[56].mxu0 }
 0x1b2   : > { %v1878_v1 = vadd.f32 %v1868_v49, %v3773_v19  ;;  %v1870_v3 = vpop.f32.mrb[57].mxu0  ;;  %v1999_v52 = vadd.f32 %v1998_v37, %v1995_v32 }
 0x1b3   : > { %v1871_v40 = vpop.f32.mrb[58].mxu0 }
 0x1b4   : > { %v3844_v53 = vadd.f32 %v2624_v55, %v1878_v1  ;;  %v1872_v51 = vpop.f32.mrb[59].mxu0 }
 0x1b6   : > { %v1996_v47 = vmul.f32 %v2629_v30, %v3844_v53 }
 0x1b8   : > { %v2001_v9 = vsel %vm1201_vm3, %v1996_v47, 0.0 }
 0x1b9   : > { %v2002_v20 = vadd.f32 %v2001_v9, %v1999_v52 }
 0x1bb   : > { %v2003_v16 = vrot.slane %v2002_v20, 4 }
 0x1bd   : > { %v2004_v8 = vadd.f32 %v2003_v16, %v2002_v20 }
 0x1bf   : > { %v2005_v56 = vrot.slane %v2004_v8, 2 }
 0x1c1   : > { %v2006_v19 = vadd.f32 %v2005_v56, %v2004_v8 }
 0x1c3   : > { %v2007_v48 = vrot.slane %v2006_v19, 1 }
 0x1c5   : > { %v2008_v59 = vadd.f32 %v2007_v48, %v2006_v19 }
 0x1c7   : > { %2705 = vmatmul.mubr.f32.vlgmr.msra.gmra.mrb[48].mxu1 %v2008_v59 }
 0x1c8   : > { %2768 = vmatpush3.bf16.msra.mxu1 %v3671_v5  ;;  %2739 = vmatprep.mubr.msk.f32.mxu1 %vm2953_vm7, %v2954_v61  ;;  %v2098_v5 = vsub.s32 0, %v3758_v57 }
 0x1c9   : > { %2769 = vmatprep.subr.bf16.mxu1 %v2952_v7 }
 0x1cc   : > { %2771 = vmatpush3.bf16.msra.mxu1 %v3682_v25 }
 0x1cd   : > { %2772 = vmatprep.subr.bf16.mxu1 %v2952_v7 }
 0x1d0   : > { %2774 = vmatpush3.bf16.msra.mxu1 %v3696_v35 }
 0x1d1   : > { %2775 = vmatprep.subr.bf16.mxu1 %v2952_v7 }
 0x1d4   : > { %2777 = vmatpush3.bf16.msra.mxu1 %v3706_v38 }
 0x1d5   : > { %2778 = vmatprep.subr.bf16.mxu1 %v2952_v7 }
 0x1d8   : > { %2780 = vmatpush3.bf16.msra.mxu1 %v3716_v43 }
 0x1d9   : > { %2781 = vmatprep.subr.bf16.mxu1 %v2952_v7 }
 0x1dc   : > { %2783 = vmatpush3.bf16.msra.mxu1 %v3726_v6 }
 0x1dd   : > { %2784 = vmatprep.subr.bf16.mxu1 %v2952_v7 }
 0x1e0   : > { %2786 = vmatpush3.bf16.msra.mxu1 %v3736_v58 }
 0x1e1   : > { %2787 = vmatprep.subr.bf16.mxu1 %v2952_v7 }
 0x1e4   : > { %2789 = vmatpush3.bf16.msra.mxu1 %v3747_v62 }
 0x29a   : > { %v2091_v25 = vpop.f32.mrb[48].mxu1 }
 0x29b   : > { %v2095_v35 = vmul.f32 0.001953125, %v2091_v25  ;;  %v2706_v38 = vpop.f32.mrb[49].mxu1 }
 0x29d   : > { %v2099_v61 = vrot.slane %v2095_v35, %v2098_v5 }
 0x29f   : > { %v2100_v43 = vsub.f32 %v3827_v29, %v2099_v61  ;;  %v2101_v60 = vsub.f32 %v3819_v41, %v2099_v61  ;;  %v2102_v6 = vsub.f32 %v3830_v15, %v2099_v61  ;;  %v2103_v63 = vsub.f32 %v3838_v34, %v2099_v61 }
 0x2a0   : > { %v2104_v58 = vsub.f32 %v3844_v53, %v2099_v61 }
 0x2a1   : > { %v2105_v14 = vmul.f32 %v2625_v27, %v2100_v43  ;;  %v2106_v7 = vmul.f32 %v3822_v22, %v2101_v60  ;;  %v2107_v62 = vmul.f32 %v2627_v45, %v2102_v6  ;;  %v2108_v57 = vmul.f32 %v2628_v50, %v2103_v63 }
 0x2a2   : > { %v2109_v0 = vmul.f32 %v2629_v30, %v2104_v58 }
 0x2a3   : > { %v2110_v2 = vmul.f32 %v2105_v14, %v2105_v14  ;;  %v2111_v10 = vmul.f32 %v2106_v7, %v2106_v7  ;;  %v2112_v11 = vmul.f32 %v2107_v62, %v2107_v62  ;;  %v2113_v13 = vmul.f32 %v2108_v57, %v2108_v57 }
 0x2a4   : > { %v2114_v54 = vmul.f32 %v2109_v0, %v2109_v0 }
 0x2a5   : > { %v2115_v12 = vadd.f32 %v2111_v10, %v2110_v2 }
 0x2a6   : > { %v2118_v55 = vsel %vm1201_vm3, %v2114_v54, 0.0 }
 0x2a7   : > { %v2116_v21 = vadd.f32 %v2115_v12, %v2112_v11 }
 0x2a9   : > { %v2117_v17 = vadd.f32 %v2116_v21, %v2113_v13 }
 0x2ab   : > { %v2119_v23 = vadd.f32 %v2118_v55, %v2117_v17 }
 0x2ad   : > { %v2120_v28 = vrot.slane %v2119_v23, 4 }
 0x2af   : > { %v2121_v4 = vadd.f32 %v2120_v28, %v2119_v23 }
 0x2b1   : > { %v2122_v31 = vrot.slane %v2121_v4, 2 }
 0x2b3   : > { %v2123_v39 = vadd.f32 %v2122_v31, %v2121_v4 }
 0x2b5   : > { %v2124_v42 = vrot.slane %v2123_v39, 1 }
 0x2b7   : > { %v2125_v22 = vadd.f32 %v2124_v42, %v2123_v39 }
 0x2b9   : > { %2740 = vmatmul.mubr.f32.vlgmr.msra.gmra.mrb[50].mxu1 %v2125_v22 }
 0x38c   : > { %v2192_v27 = vpop.f32.mrb[50].mxu1 }
 0x38d   : > { %v2196_v45 = vmul.f32 0.001953125, %v2192_v27  ;;  %v2741_v18 = vpop.f32.mrb[51].mxu1 }
 0x38f   : > { %v2198_v33 = vadd.f32 1e-05, %v2196_v45 }
 0x391   : > { %2921 = vrsqrt.f32 %v2198_v33 }
 0x39b   : > { %v2922_v24 = vpop.eup %2921 }
 0x39c   : > { %v2200_v46 = vmul.f32 %v2922_v24, %v2197_v44 }
 0x39e   : > { %v2202_v50 = vmul.f32 %v2200_v46, %v2095_v35  ;;  %v2208_v36 = vrot.slane %v2200_v46, %v2098_v5 }
 0x3a0   : > { %v2203_v49 = vsub.f32 %v2201_v26, %v2202_v50  ;;  %v2210_v1 = vmul.f32 %v2208_v36, %v3827_v29  ;;  %v2211_v3 = vmul.f32 %v2208_v36, %v3819_v41  ;;  %v2212_v37 = vmul.f32 %v2208_v36, %v3830_v15 }
 0x3a1   : > { %v2213_v32 = vmul.f32 %v2208_v36, %v3838_v34  ;;  %v2214_v40 = vmul.f32 %v2208_v36, %v3844_v53 }
 0x3a2   : > { %v2219_v30 = vrot.slane %v2203_v49, %v2098_v5 }
 0x3a4   : > { %v2221_v51 = vadd.f32 %v2219_v30, %v2210_v1  ;;  %v2222_v47 = vadd.f32 %v2219_v30, %v2211_v3  ;;  %v2223_v52 = vadd.f32 %v2219_v30, %v2212_v37  ;;  %v2224_v9 = vadd.f32 %v2219_v30, %v2213_v32 }
 0x3a5   : > { %v2225_v20 = vadd.f32 %v2219_v30, %v2214_v40 }
 0x3a6   : > { %v2630_v16 = vmul.f32 -1.442695, %v2221_v51  ;;  %v2631_v8 = vmul.f32 -1.442695, %v2222_v47  ;;  %v2632_v56 = vmul.f32 -1.442695, %v2223_v52 }
 0x3a7   : > { %v2633_v19 = vmul.f32 -1.442695, %v2224_v9  ;;  %v2634_v29 = vmul.f32 -1.442695, %v2225_v20 }
 0x3a8   : > { %2923 = vpow2.f32 %v2630_v16 }
 0x3a9   : > { %2925 = vpow2.f32 %v2631_v8 }
 0x3aa   : > { %2927 = vpow2.f32 %v2632_v56 }
 0x3ab   : > { %2929 = vpow2.f32 %v2633_v19 }
 0x3ac   : > { %2931 = vpow2.f32 %v2634_v29 }
 0x3b2   : > { %v2924_v41 = vpop.eup %2923 }
 0x3b3   : > { %v2926_v15 = vpop.eup %2925  ;;  %v2241_v34 = vadd.f32 1.0, %v2924_v41 }
 0x3b4   : > { %v2928_v53 = vpop.eup %2927  ;;  %v2242_v48 = vadd.f32 1.0, %v2926_v15 }
 0x3b5   : > { %v2930_v59 = vpop.eup %2929  ;;  %v2243_v5 = vadd.f32 1.0, %v2928_v53  ;;  %2933 = vrcp.f32 %v2241_v34 }
 0x3b6   : > { %v2932_v25 = vpop.eup %2931  ;;  %v2244_v35 = vadd.f32 1.0, %v2930_v59  ;;  %2935 = vrcp.f32 %v2242_v48 }
 0x3b7   : > { %v2245_v38 = vadd.f32 1.0, %v2932_v25  ;;  %2937 = vrcp.f32 %v2243_v5 }
 0x3b8   : > { %2939 = vrcp.f32 %v2244_v35 }
 0x3b9   : > { %2941 = vrcp.f32 %v2245_v38 }
 0x3bf   : > { %v2934_v61 = vpop.eup %2933 }
 0x3c0   : > { %v2936_v43 = vpop.eup %2935  ;;  %v2256_v60 = vmul.f32 %v2934_v61, %v2221_v51 }
 0x3c1   : > { %v2938_v6 = vpop.eup %2937  ;;  %v2257_v63 = vmul.f32 %v2936_v43, %v2222_v47 }
 0x3c2   : > { %v2940_v58 = vpop.eup %2939  ;;  %v2258_v14 = vmul.f32 %v2938_v6, %v2223_v52  ;;  %2261 = vst [vmem:[%s251_s9] sm:$0xff] %v2256_v60 }
 0x3c3   : > { %v2942_v7 = vpop.eup %2941  ;;  %v2259_v62 = vmul.f32 %v2940_v58, %v2224_v9  ;;  %2262 = vst [vmem:[%s251_s9 + $0x8] sm:$0xff] %v2257_v63 }
 0x3c4   : > { %v2260_v0 = vmul.f32 %v2942_v7, %v2225_v20  ;;  %2263 = vst [vmem:[%s251_s9 + $0x10] sm:$0xff] %v2258_v14 }
 0x3c5   : > { %2264 = vst [vmem:[%s251_s9 + $0x18] sm:$0xff] %v2259_v62 }
 0x3c6   : > { %2265 = vst [vmem:[%s251_s9 + $0x20] sm:$0x3f] %v2260_v0 }
 0x3c7 PF: > { %s16_s21 = sadd.s32 1, %s2949_s21  }
 0x3c8   : > { %p13_p4 = scmp.ge.s32.totalorder %s16_s21, 4  }
 0x3ca   :  { %15 = sbr.rel (!%p13_p4) target bundleno = 1 (0x1), region = 82 }

</bundles_post_ra>
